<compile_context>
chip_gen: v7x
topology: tpu7x:2x2x1
jax: 0.10.0
libtpu: 0.0.40
codegen_flags: <defaults>
</compile_context>

<pallas_src>
import jax
import jax.numpy as jnp
from jax.experimental import pallas as pl
from jax.experimental.pallas import tpu as pltpu

EPS = 1e-5
HIDDEN = 400  # fixed by the PyTorch module


def mirnanet_kernel(x_ref, w1_ref, g1_ref, be1_ref,
                    w2_ref, g2_ref, be2_ref, o_ref):
    B = x_ref.shape[0]
    inv_b = jnp.float32(1.0 / B)

    # ---- Linear 1 (MXU, bf16 in / f32 acc). Bias omitted: cancels under BN.
    h1 = jnp.dot(x_ref[...], w1_ref[...],
                 preferred_element_type=jnp.float32)          # (B, Hp) f32

    # One-pass batch stats (biased variance, as torch BatchNorm1d training).
    s1 = jnp.sum(h1, axis=0, keepdims=True)
    ss1 = jnp.sum(h1 * h1, axis=0, keepdims=True)
    mean1 = s1 * inv_b
    var1 = jnp.maximum(ss1 * inv_b - mean1 * mean1, 0.0)
    scale1 = g1_ref[...] * jax.lax.rsqrt(var1 + EPS)          # (1, Hp)
    shift1 = be1_ref[...] - mean1 * scale1
    a1 = jnp.maximum(h1 * scale1 + shift1, 0.0)               # BN+ReLU fused
    # dropout(p=0.3): identity (see TODO at top)

    # ---- Linear 2 (MXU) + BN2 + ReLU (same fusion). Bias omitted.
    h2 = jnp.dot(a1.astype(jnp.bfloat16), w2_ref[...],
                 preferred_element_type=jnp.float32)          # (B, m_length)
    s2 = jnp.sum(h2, axis=0, keepdims=True)
    ss2 = jnp.sum(h2 * h2, axis=0, keepdims=True)
    mean2 = s2 * inv_b
    var2 = jnp.maximum(ss2 * inv_b - mean2 * mean2, 0.0)
    scale2 = g2_ref[...] * jax.lax.rsqrt(var2 + EPS)
    shift2 = be2_ref[...] - mean2 * scale2
    a2 = jnp.maximum(h2 * scale2 + shift2, 0.0)
    # dropout(p=0.4): identity

    o_ref[...] = a2.astype(o_ref.dtype)


def mirnanet_forward(x, w1, b1, g1, be1, w2, b2, g2, be2):
    # b1/b2 are accepted for API parity with the PyTorch module but dropped:
    # a per-feature bias before batch-statistics BN cancels exactly.
    del b1, b2
    B, _ = x.shape
    H = w1.shape[1]
    m_length = w2.shape[1]

    # Pad hidden (400 -> 512) for lane-dense layout. Zero gamma/beta on the
    # pad makes the padded activations exactly 0, and zero W2 rows keep the
    # second matmul unaffected.
    Hp = ((H + 127) // 128) * 128
    if Hp != H:
        pad = Hp - H
        w1 = jnp.pad(w1, ((0, 0), (0, pad)))
        g1 = jnp.pad(g1, ((0, 0), (0, pad)))
        be1 = jnp.pad(be1, ((0, 0), (0, pad)))
        w2 = jnp.pad(w2, ((0, pad), (0, 0)))

    x_bf = x.astype(jnp.bfloat16)
    w1_bf = w1.astype(jnp.bfloat16)
    w2_bf = w2.astype(jnp.bfloat16)

    full = lambda shape: pl.BlockSpec(shape, lambda: tuple(0 for _ in shape))
    return pl.pallas_call(
        mirnanet_kernel,
        out_shape=jax.ShapeDtypeStruct((B, m_length), jnp.float32),
        in_specs=[
            full(x_bf.shape),
            full(w1_bf.shape), full(g1.shape), full(be1.shape),
            full(w2_bf.shape), full(g2.shape), full(be2.shape),
        ],
        out_specs=full((B, m_length)),
    )(x_bf, w1_bf, g1, be1, w2_bf, g2, be2)


def make_params(key, mirna_length, m_length, hidden=HIDDEN):
    ks = jax.random.split(key, 8)
    # Deterministic synthetic init (shapes match nn.Linear / nn.BatchNorm1d).
    w1 = jax.random.normal(ks[0], (mirna_length, hidden), jnp.float32) * 0.05
    b1 = jax.random.normal(ks[1], (1, hidden), jnp.float32) * 0.05
    g1 = 1.0 + 0.1 * jax.random.normal(ks[2], (1, hidden), jnp.float32)
    be1 = 0.1 * jax.random.normal(ks[3], (1, hidden), jnp.float32)
    w2 = jax.random.normal(ks[4], (hidden, m_length), jnp.float32) * 0.05
    b2 = jax.random.normal(ks[5], (1, m_length), jnp.float32) * 0.05
    g2 = 1.0 + 0.1 * jax.random.normal(ks[6], (1, m_length), jnp.float32)
    be2 = 0.1 * jax.random.normal(ks[7], (1, m_length), jnp.float32)
    return w1, b1, g1, be1, w2, b2, g2, be2


if __name__ == "__main__":
    key = jax.random.PRNGKey(0)
    k_x, k_p = jax.random.split(key)

    B = 128               # batch (>=2 required for BatchNorm batch stats)
    mirna_length = 256    # miRNA input dimension
    m_length = 128        # output dimension
    x = jax.random.normal(k_x, (B, mirna_length), jnp.float32)
    params = make_params(k_p, mirna_length, m_length)

    out = mirnanet_forward(x, *params)
    out = jax.block_until_ready(out)

    # Pure-JAX reference with the *same* bf16 matmul precision (the bf16 cast
    # is a deliberate precision trade-off; biases ARE included here to verify
    # that dropping them in the kernel is mathematically a no-op under BN).
    def ref(x, w1, b1, g1, be1, w2, b2, g2, be2):
        def bn_relu(h, g, be):
            m = jnp.mean(h, axis=0, keepdims=True)
            v = jnp.mean((h - m) ** 2, axis=0, keepdims=True)
            return jnp.maximum(g * (h - m) / jnp.sqrt(v + EPS) + be, 0.0)

        h1 = jnp.dot(x.astype(jnp.bfloat16), w1.astype(jnp.bfloat16),
                     preferred_element_type=jnp.float32) + b1
        a1 = bn_relu(h1, g1, be1)
        h2 = jnp.dot(a1.astype(jnp.bfloat16), w2.astype(jnp.bfloat16),
                     preferred_element_type=jnp.float32) + b2
        return bn_relu(h2, g2, be2)

    expected = ref(x, *params)
    assert out.shape == (B, m_length)
    assert bool(jnp.all(jnp.isfinite(out)))
    assert jnp.allclose(out, expected, atol=2e-3, rtol=2e-3)
    print("KERNEL_OK")
</pallas_src>

<mosaic_0001>
module attributes {stable_mosaic.version = 11 : i64} {
  func.func @mirnanet_kernel(%arg0: memref<128x256xbf16, #tpu.memory_space<vmem>>, %arg1: memref<256x512xbf16, #tpu.memory_space<vmem>>, %arg2: memref<1x512xf32, #tpu.memory_space<vmem>>, %arg3: memref<1x512xf32, #tpu.memory_space<vmem>>, %arg4: memref<512x128xbf16, #tpu.memory_space<vmem>>, %arg5: memref<1x128xf32, #tpu.memory_space<vmem>>, %arg6: memref<1x128xf32, #tpu.memory_space<vmem>>, %arg7: memref<128x128xf32, #tpu.memory_space<vmem>>) attributes {dimension_semantics = [], scalar_prefetch = 0 : i64, scratch_operands = 0 : i64, tpu.core_type = #tpu.core_type<tc>} {
    %c0 = arith.constant 0 : index
    %c0_0 = arith.constant 0 : index
    %0 = vector.load %arg0[%c0, %c0_0] : memref<128x256xbf16, #tpu.memory_space<vmem>>, vector<128x256xbf16>
    %c0_1 = arith.constant 0 : index
    %c0_2 = arith.constant 0 : index
    %1 = vector.load %arg1[%c0_1, %c0_2] : memref<256x512xbf16, #tpu.memory_space<vmem>>, vector<256x512xbf16>
    %cst = arith.constant dense<0.000000e+00> : vector<128x512xf32>
    %2 = tpu.matmul %0, %1, %cst {dimension_numbers = #tpu.dot_dimension_numbers<[1], [0], [0], [1], [0, 0, 1, 1], [], []>} : vector<128x256xbf16>, vector<256x512xbf16>, vector<128x512xf32> -> vector<128x512xf32>
    %cst_3 = arith.constant dense<0.000000e+00> : vector<512xf32>
    %3 = vector.multi_reduction <add>, %2, %cst_3 [0] : vector<128x512xf32> to vector<512xf32>
    %4 = vector.shape_cast %3 : vector<512xf32> to vector<1x512xf32>
    %5 = arith.mulf %2, %2 : vector<128x512xf32>
    %cst_4 = arith.constant dense<0.000000e+00> : vector<512xf32>
    %6 = vector.multi_reduction <add>, %5, %cst_4 [0] : vector<128x512xf32> to vector<512xf32>
    %7 = vector.shape_cast %6 : vector<512xf32> to vector<1x512xf32>
    %cst_5 = arith.constant 7.812500e-03 : f32
    %8 = vector.broadcast %cst_5 : f32 to vector<1x512xf32>
    %9 = arith.mulf %4, %8 : vector<1x512xf32>
    %cst_6 = arith.constant 7.812500e-03 : f32
    %10 = vector.broadcast %cst_6 : f32 to vector<1x512xf32>
    %11 = arith.mulf %7, %10 : vector<1x512xf32>
    %12 = arith.mulf %9, %9 : vector<1x512xf32>
    %13 = arith.subf %11, %12 : vector<1x512xf32>
    %cst_7 = arith.constant 0.000000e+00 : f32
    %14 = vector.broadcast %cst_7 : f32 to vector<1x512xf32>
    %15 = arith.maximumf %13, %14 : vector<1x512xf32>
    %c0_8 = arith.constant 0 : index
    %c0_9 = arith.constant 0 : index
    %16 = vector.load %arg2[%c0_8, %c0_9] : memref<1x512xf32, #tpu.memory_space<vmem>>, vector<1x512xf32>
    %cst_10 = arith.constant 9.99999974E-6 : f32
    %17 = vector.broadcast %cst_10 : f32 to vector<1x512xf32>
    %18 = arith.addf %15, %17 : vector<1x512xf32>
    %19 = math.rsqrt %18 : vector<1x512xf32>
    %20 = arith.mulf %16, %19 : vector<1x512xf32>
    %c0_11 = arith.constant 0 : index
    %c0_12 = arith.constant 0 : index
    %21 = vector.load %arg3[%c0_11, %c0_12] : memref<1x512xf32, #tpu.memory_space<vmem>>, vector<1x512xf32>
    %22 = arith.mulf %9, %20 : vector<1x512xf32>
    %23 = arith.subf %21, %22 : vector<1x512xf32>
    %24 = vector.broadcast %20 : vector<1x512xf32> to vector<128x512xf32>
    %25 = arith.mulf %2, %24 : vector<128x512xf32>
    %26 = vector.broadcast %23 : vector<1x512xf32> to vector<128x512xf32>
    %27 = arith.addf %25, %26 : vector<128x512xf32>
    %cst_13 = arith.constant 0.000000e+00 : f32
    %28 = vector.broadcast %cst_13 : f32 to vector<128x512xf32>
    %29 = arith.maximumf %27, %28 : vector<128x512xf32>
    %30 = arith.truncf %29 : vector<128x512xf32> to vector<128x512xbf16>
    %c0_14 = arith.constant 0 : index
    %c0_15 = arith.constant 0 : index
    %31 = vector.load %arg4[%c0_14, %c0_15] : memref<512x128xbf16, #tpu.memory_space<vmem>>, vector<512x128xbf16>
    %cst_16 = arith.constant dense<0.000000e+00> : vector<128x128xf32>
    %32 = tpu.matmul %30, %31, %cst_16 {dimension_numbers = #tpu.dot_dimension_numbers<[1], [0], [0], [1], [0, 0, 1, 1], [], []>} : vector<128x512xbf16>, vector<512x128xbf16>, vector<128x128xf32> -> vector<128x128xf32>
    %cst_17 = arith.constant dense<0.000000e+00> : vector<128xf32>
    %33 = vector.multi_reduction <add>, %32, %cst_17 [0] : vector<128x128xf32> to vector<128xf32>
    %34 = vector.shape_cast %33 : vector<128xf32> to vector<1x128xf32>
    %35 = arith.mulf %32, %32 : vector<128x128xf32>
    %cst_18 = arith.constant dense<0.000000e+00> : vector<128xf32>
    %36 = vector.multi_reduction <add>, %35, %cst_18 [0] : vector<128x128xf32> to vector<128xf32>
    %37 = vector.shape_cast %36 : vector<128xf32> to vector<1x128xf32>
    %cst_19 = arith.constant 7.812500e-03 : f32
    %38 = vector.broadcast %cst_19 : f32 to vector<1x128xf32>
    %39 = arith.mulf %34, %38 : vector<1x128xf32>
    %cst_20 = arith.constant 7.812500e-03 : f32
    %40 = vector.broadcast %cst_20 : f32 to vector<1x128xf32>
    %41 = arith.mulf %37, %40 : vector<1x128xf32>
    %42 = arith.mulf %39, %39 : vector<1x128xf32>
    %43 = arith.subf %41, %42 : vector<1x128xf32>
    %cst_21 = arith.constant 0.000000e+00 : f32
    %44 = vector.broadcast %cst_21 : f32 to vector<1x128xf32>
    %45 = arith.maximumf %43, %44 : vector<1x128xf32>
    %c0_22 = arith.constant 0 : index
    %c0_23 = arith.constant 0 : index
    %46 = vector.load %arg5[%c0_22, %c0_23] : memref<1x128xf32, #tpu.memory_space<vmem>>, vector<1x128xf32>
    %cst_24 = arith.constant 9.99999974E-6 : f32
    %47 = vector.broadcast %cst_24 : f32 to vector<1x128xf32>
    %48 = arith.addf %45, %47 : vector<1x128xf32>
    %49 = math.rsqrt %48 : vector<1x128xf32>
    %50 = arith.mulf %46, %49 : vector<1x128xf32>
    %c0_25 = arith.constant 0 : index
    %c0_26 = arith.constant 0 : index
    %51 = vector.load %arg6[%c0_25, %c0_26] : memref<1x128xf32, #tpu.memory_space<vmem>>, vector<1x128xf32>
    %52 = arith.mulf %39, %50 : vector<1x128xf32>
    %53 = arith.subf %51, %52 : vector<1x128xf32>
    %54 = vector.broadcast %50 : vector<1x128xf32> to vector<128x128xf32>
    %55 = arith.mulf %32, %54 : vector<128x128xf32>
    %56 = vector.broadcast %53 : vector<1x128xf32> to vector<128x128xf32>
    %57 = arith.addf %55, %56 : vector<128x128xf32>
    %cst_27 = arith.constant 0.000000e+00 : f32
    %58 = vector.broadcast %cst_27 : f32 to vector<128x128xf32>
    %59 = arith.maximumf %57, %58 : vector<128x128xf32>
    %c0_28 = arith.constant 0 : index
    %c0_29 = arith.constant 0 : index
    %60 = vector.load %arg7[%c0_28, %c0_29] : memref<128x128xf32, #tpu.memory_space<vmem>>, vector<128x128xf32>
    tpu.vector_store %arg7[%c0_28, %c0_29], %59 {strides = array<i32>} : memref<128x128xf32, #tpu.memory_space<vmem>>, vector<128x128xf32>,
    return
  }
}

</mosaic_0001>

<bundles_post_ra>
// kernel: tpu_custom_call.1
= control target key start
LH: loop header
LB: loop body
LE: loop exit
PB: predicated region body
PF: predicated region fallthrough
CT: control target
= control target key end

     0   :  { %12 = vsyncpa [#allocation3], 0  ;;  %s3321_s0 = inlined_call_operand.hbm [shape: bf16[128,256], index: 0, kind: input, shape index: {}]   ;;  %s3322_s1 = inlined_call_operand.hbm [shape: bf16[256,512], index: 1, kind: input, shape index: {}]   ;;  %s3323_s2 = inlined_call_operand.vmem [shape: f32[1,512], index: 2, kind: input, shape index: {}]   ;;  %s3324_s3 = inlined_call_operand.vmem [shape: f32[1,512], index: 3, kind: input, shape index: {}]   ;;  %s3325_s4 = inlined_call_operand.hbm [shape: bf16[512,128], index: 4, kind: input, shape index: {}]   ;;  %s3326_s5 = inlined_call_operand.vmem [shape: f32[1,128], index: 5, kind: input, shape index: {}]   ;;  %s3327_s6 = inlined_call_operand.vmem [shape: f32[1,128], index: 6, kind: input, shape index: {}]   ;;  %s3328_s7 = inlined_call_operand.hbm [shape: f32[128,128], index: 7, kind: output, shape index: {}]  }
   0x1   :  { %13 = vsyncpa [#allocation6], 0 }
   0x2   :  { %14 = vsyncpa [#allocation4], 0  ;;  %s2488_s24 = smov [#allocation5]   ;;  %s2394_s28 = scalar_lea.hbm %s3322_s1, 8192 }
   0x3   :  { %s32_s25 = sshll.u32 %s2488_s24, 4  ;;  %p2395_p0 = scmp.ne.s32.totalorder %s3322_s1, %s2394_s28  ;;  %s33_s25 = int_to_ptr.vmem [resolvable:$true] %s32_s25 }
   0x4   :  { %p2398_p1 = scmp.lt.u32.totalorder %s2394_s28, %s3322_s1 }
   0x6   :  { %p2400_p2 = pnand %p2398_p1, %p2395_p0 }
   0x8   :  { %2403 = shalt.err (!%p2400_p2)
}
   0x9   :  { %s2404_s10 = scalar_lea.vmem %s33_s25, 8192  ;;  %p2409_p4 = scmp.lt.s32.totalorder %s33_s25, %s33_s25 }
   0xa   :  { %p2405_p3 = scmp.ne.s32.totalorder %s33_s25, %s2404_s10  ;;  %p2410_p5 = scmp.lt.s32.totalorder %s2404_s10, %s2404_s10 }
   0xc   :  { %p2411_p6 = por %p2410_p5, %p2409_p4 }
   0xe   :  { %p2412_p7 = pnand %p2411_p6, %p2405_p3 }
  0x10   :  { %2415 = shalt.err (!%p2412_p7)
}
  0x11   :  { %s2489_s11 = smov 256   ;;  %s2490_s12 = smov 16  }
  0x12   :  { %38 = dma.hbm_to_vmem [thread:$0]  %s3322_s1, 8192, %s33_s25, [#allocation6], %s2489_s11, %s2489_s11, %s2490_s12  }
  0x13   :  { %s2491_s15 = smov [#allocation2]   ;;  %s2416_s19 = scalar_lea.hbm %s3321_s0, 2048 }
  0x14   :  { %s20_s16 = sshll.u32 %s2491_s15, 4  ;;  %p2417_p8 = scmp.ne.s32.totalorder %s3321_s0, %s2416_s19  ;;  %s21_s16 = int_to_ptr.vmem [resolvable:$true] %s20_s16 }
  0x15   :  { %p2420_p9 = scmp.lt.u32.totalorder %s2416_s19, %s3321_s0 }
  0x17   :  { %p2422_p10 = pnand %p2420_p9, %p2417_p8 }
  0x19   :  { %2425 = shalt.err (!%p2422_p10)
}
  0x1a   :  { %s2426_s24 = scalar_lea.vmem %s21_s16, 2048  ;;  %p2431_p12 = scmp.lt.s32.totalorder %s21_s16, %s21_s16 }
  0x1b   :  { %p2427_p11 = scmp.ne.s32.totalorder %s21_s16, %s2426_s24  ;;  %p2432_p13 = scmp.lt.s32.totalorder %s2426_s24, %s2426_s24 }
  0x1d   :  { %p2433_p0 = por %p2432_p13, %p2431_p12 }
  0x1f   :  { %p2434_p1 = pnand %p2433_p0, %p2427_p11 }
  0x21   :  { %2437 = shalt.err (!%p2434_p1)
}
  0x22   :  { %s2492_s1 = smov 128   ;;  %s2493_s25 = smov 8  }
  0x23   :  { %26 = dma.hbm_to_vmem [thread:$0]  %s3321_s0, 2048, %s21_s16, [#allocation3], %s2492_s1, %s2492_s1, %s2493_s25  }
  0x24   :  { %s2494_s28 = smov [#allocation7]   ;;  %s2438_s9 = scalar_lea.hbm %s3325_s4, 4096 }
  0x25   :  { %s48_s29 = sshll.u32 %s2494_s28, 4  ;;  %p2439_p2 = scmp.ne.s32.totalorder %s3325_s4, %s2438_s9  ;;  %s49_s29 = int_to_ptr.vmem [resolvable:$true] %s48_s29 }
  0x26   :  { %p2442_p3 = scmp.lt.u32.totalorder %s2438_s9, %s3325_s4 }
  0x28   :  { %p2444_p4 = pnand %p2442_p3, %p2439_p2 }
  0x2a   :  { %2447 = shalt.err (!%p2444_p4)
}
  0x2b   :  { %s2448_s14 = scalar_lea.vmem %s49_s29, 4096  ;;  %p2453_p6 = scmp.lt.s32.totalorder %s49_s29, %s49_s29 }
  0x2c   :  { %p2449_p5 = scmp.ne.s32.totalorder %s49_s29, %s2448_s14  ;;  %p2454_p7 = scmp.lt.s32.totalorder %s2448_s14, %s2448_s14 }
  0x2e   :  { %p2455_p8 = por %p2454_p7, %p2453_p6 }
  0x30   :  { %p2456_p9 = pnand %p2455_p8, %p2449_p5 }
  0x32   :  { %2459 = shalt.err (!%p2456_p9)
}
  0x33   :  { %s2495_s0 = smov 64   ;;  %s2496_s15 = smov 4  }
  0x34   :  { %54 = dma.hbm_to_vmem [thread:$0]  %s3325_s4, 4096, %s49_s29, [#allocation6], %s2495_s0, %s2495_s0, %s2496_s15  }
  0x35   :  { %2482 = dma.done.wait [#allocation3], 2048  }
  0x36   :  { %2483 = vsyncadd [#allocation3], 4294965248 }
  0x37   :  { %2484 = dma.done.wait [#allocation6], 12288  }
  0x38   :  { %2485 = vsyncadd [#allocation6], 4294955008  ;;  %v2232_v0 = vld [vmem:[#allocation5 + $0x4] ss:$16 sps:$4 sm:$0xff]   ;;  %v2234_v1 = vld [vmem:[#allocation5 + $0xc] ss:$16 sps:$4 sm:$0xff]  }
  0x39   :  { %549 = vmatprep.subr.bf16.mxu0 %v2232_v0  ;;  %v2236_v2 = vld [vmem:[#allocation5] ss:$16 sps:$4 sm:$0xff]   ;;  %v2237_v3 = vld [vmem:[#allocation5 + $0x8] ss:$16 sps:$4 sm:$0xff]   ;;  %662 = vmatprep.subr.bf16.mxu1 %v2234_v1  ;;  %v2238_v4 = vld [vmem:[#allocation5 + $0x24] ss:$16 sps:$4 sm:$0xff]  }
  0x3a   :  { %550 = vmatpush1.bf16.msra.mxu0 %v2236_v2  ;;  %663 = vmatpush1.bf16.msra.mxu1 %v2237_v3  ;;  %v2240_v5 = vld [vmem:[#allocation5 + $0x2c] ss:$16 sps:$4 sm:$0xff]   ;;  %v2242_v6 = vld [vmem:[#allocation5 + $0x20] ss:$16 sps:$4 sm:$0xff]   ;;  %v2243_v7 = vld [vmem:[#allocation5 + $0x28] ss:$16 sps:$4 sm:$0xff]  }
  0x3b   :  { %551 = vmatprep.subr.bf16.mxu0 %v2238_v4  ;;  %664 = vmatprep.subr.bf16.mxu1 %v2240_v5  ;;  %v2244_v8 = vld [vmem:[#allocation5 + $0x44] ss:$16 sps:$4 sm:$0xff]   ;;  %v2246_v9 = vld [vmem:[#allocation5 + $0x4c] ss:$16 sps:$4 sm:$0xff]   ;;  %v2248_v10 = vld [vmem:[#allocation5 + $0x40] ss:$16 sps:$4 sm:$0xff]  }
  0x3c   :  { %v2249_v11 = vld [vmem:[#allocation5 + $0x48] ss:$16 sps:$4 sm:$0xff]   ;;  %v2250_v12 = vld [vmem:[#allocation5 + $0x64] ss:$16 sps:$4 sm:$0xff]   ;;  %v2252_v13 = vld [vmem:[#allocation5 + $0x6c] ss:$16 sps:$4 sm:$0xff]  }
  0x3d   :  { %v2254_v14 = vld [vmem:[#allocation5 + $0x60] ss:$16 sps:$4 sm:$0xff]   ;;  %v2255_v15 = vld [vmem:[#allocation5 + $0x68] ss:$16 sps:$4 sm:$0xff]   ;;  %v2256_v16 = vld [vmem:[#allocation5 + $0x84] ss:$16 sps:$4 sm:$0xff]  }
  0x3e   :  { %552 = vmatpush1.bf16.msra.mxu0 %v2242_v6  ;;  %665 = vmatpush1.bf16.msra.mxu1 %v2243_v7  ;;  %v2258_v17 = vld [vmem:[#allocation5 + $0x8c] ss:$16 sps:$4 sm:$0xff]   ;;  %v2260_v18 = vld [vmem:[#allocation5 + $0x80] ss:$16 sps:$4 sm:$0xff]   ;;  %v2261_v19 = vld [vmem:[#allocation5 + $0x88] ss:$16 sps:$4 sm:$0xff]  }
  0x3f   :  { %553 = vmatprep.subr.bf16.mxu0 %v2244_v8  ;;  %666 = vmatprep.subr.bf16.mxu1 %v2246_v9  ;;  %v2262_v20 = vld [vmem:[#allocation5 + $0xa4] ss:$16 sps:$4 sm:$0xff]   ;;  %v2264_v21 = vld [vmem:[#allocation5 + $0xac] ss:$16 sps:$4 sm:$0xff]   ;;  %v2266_v22 = vld [vmem:[#allocation5 + $0xa0] ss:$16 sps:$4 sm:$0xff]  }
  0x40   :  { %v2267_v23 = vld [vmem:[#allocation5 + $0xa8] ss:$16 sps:$4 sm:$0xff]   ;;  %v2268_v24 = vld [vmem:[#allocation5 + $0xc4] ss:$16 sps:$4 sm:$0xff]   ;;  %v2270_v25 = vld [vmem:[#allocation5 + $0xcc] ss:$16 sps:$4 sm:$0xff]  }
  0x41   :  { %v2272_v26 = vld [vmem:[#allocation5 + $0xc0] ss:$16 sps:$4 sm:$0xff]   ;;  %v2273_v27 = vld [vmem:[#allocation5 + $0xc8] ss:$16 sps:$4 sm:$0xff]   ;;  %v2274_v28 = vld [vmem:[#allocation5 + $0xe4] ss:$16 sps:$4 sm:$0xff]  }
  0x42   :  { %554 = vmatpush1.bf16.msra.mxu0 %v2248_v10  ;;  %667 = vmatpush1.bf16.msra.mxu1 %v2249_v11  ;;  %v2276_v29 = vld [vmem:[#allocation5 + $0xec] ss:$16 sps:$4 sm:$0xff]   ;;  %v2278_v30 = vld [vmem:[#allocation5 + $0xe0] ss:$16 sps:$4 sm:$0xff]   ;;  %v2279_v31 = vld [vmem:[#allocation5 + $0xe8] ss:$16 sps:$4 sm:$0xff]  }
  0x43   :  { %555 = vmatprep.subr.bf16.mxu0 %v2250_v12  ;;  %668 = vmatprep.subr.bf16.mxu1 %v2252_v13  ;;  %v2280_v32 = vld [vmem:[#allocation5 + $0x104] ss:$16 sps:$4 sm:$0xff]   ;;  %v2282_v33 = vld [vmem:[#allocation5 + $0x10c] ss:$16 sps:$4 sm:$0xff]   ;;  %v2284_v34 = vld [vmem:[#allocation5 + $0x100] ss:$16 sps:$4 sm:$0xff]  }
  0x44   :  { %v2285_v35 = vld [vmem:[#allocation5 + $0x108] ss:$16 sps:$4 sm:$0xff]   ;;  %v2286_v36 = vld [vmem:[#allocation5 + $0x124] ss:$16 sps:$4 sm:$0xff]   ;;  %v2288_v37 = vld [vmem:[#allocation5 + $0x12c] ss:$16 sps:$4 sm:$0xff]  }
  0x45   :  { %v2290_v38 = vld [vmem:[#allocation5 + $0x120] ss:$16 sps:$4 sm:$0xff]   ;;  %v2291_v39 = vld [vmem:[#allocation5 + $0x128] ss:$16 sps:$4 sm:$0xff]   ;;  %v2292_v40 = vld [vmem:[#allocation5 + $0x144] ss:$16 sps:$4 sm:$0xff]  }
  0x46   :  { %556 = vmatpush1.bf16.msra.mxu0 %v2254_v14  ;;  %669 = vmatpush1.bf16.msra.mxu1 %v2255_v15  ;;  %v2294_v41 = vld [vmem:[#allocation5 + $0x14c] ss:$16 sps:$4 sm:$0xff]   ;;  %v2296_v42 = vld [vmem:[#allocation5 + $0x140] ss:$16 sps:$4 sm:$0xff]   ;;  %v2297_v43 = vld [vmem:[#allocation5 + $0x148] ss:$16 sps:$4 sm:$0xff]  }
  0x47   :  { %557 = vmatprep.subr.bf16.mxu0 %v2256_v16  ;;  %670 = vmatprep.subr.bf16.mxu1 %v2258_v17  ;;  %v2298_v44 = vld [vmem:[#allocation5 + $0x164] ss:$16 sps:$4 sm:$0xff]   ;;  %v2300_v45 = vld [vmem:[#allocation5 + $0x16c] ss:$16 sps:$4 sm:$0xff]   ;;  %v2302_v46 = vld [vmem:[#allocation5 + $0x160] ss:$16 sps:$4 sm:$0xff]  }
  0x48   :  { %v2303_v47 = vld [vmem:[#allocation5 + $0x168] ss:$16 sps:$4 sm:$0xff]   ;;  %v2330_v48 = vld [vmem:[#allocation2 + $0x4] ss:$8 sps:$4 sm:$0xff]   ;;  %v2308_v51 = vld [vmem:[#allocation5 + $0x180] ss:$16 sps:$4 sm:$0xff]  }
  0x49   :  { %v2304_v49 = vld [vmem:[#allocation5 + $0x184] ss:$16 sps:$4 sm:$0xff]   ;;  %v2306_v50 = vld [vmem:[#allocation5 + $0x18c] ss:$16 sps:$4 sm:$0xff]   ;;  %581 = vmatprep.mubr.bf16.mxu0 %v2330_v48  ;;  %694 = vmatprep.mubr.bf16.mxu1 %v2330_v48  ;;  %v2309_v52 = vld [vmem:[#allocation5 + $0x188] ss:$16 sps:$4 sm:$0xff]  }
  0x4a   :  { %558 = vmatpush1.bf16.msra.mxu0 %v2260_v18  ;;  %671 = vmatpush1.bf16.msra.mxu1 %v2261_v19  ;;  %v2310_v53 = vld [vmem:[#allocation5 + $0x1a4] ss:$16 sps:$4 sm:$0xff]   ;;  %v2312_v54 = vld [vmem:[#allocation5 + $0x1ac] ss:$16 sps:$4 sm:$0xff]   ;;  %v2314_v55 = vld [vmem:[#allocation5 + $0x1a0] ss:$16 sps:$4 sm:$0xff]  }
  0x4b   :  { %559 = vmatprep.subr.bf16.mxu0 %v2262_v20  ;;  %672 = vmatprep.subr.bf16.mxu1 %v2264_v21  ;;  %v2315_v56 = vld [vmem:[#allocation5 + $0x1a8] ss:$16 sps:$4 sm:$0xff]   ;;  %v2316_v57 = vld [vmem:[#allocation5 + $0x1c4] ss:$16 sps:$4 sm:$0xff]   ;;  %v2318_v58 = vld [vmem:[#allocation5 + $0x1cc] ss:$16 sps:$4 sm:$0xff]  }
  0x4c   :  { %v2320_v59 = vld [vmem:[#allocation5 + $0x1c0] ss:$16 sps:$4 sm:$0xff]   ;;  %v2321_v60 = vld [vmem:[#allocation5 + $0x1c8] ss:$16 sps:$4 sm:$0xff]   ;;  %v2322_v61 = vld [vmem:[#allocation5 + $0x1e4] ss:$16 sps:$4 sm:$0xff]  }
  0x4d   :  { %v2324_v62 = vld [vmem:[#allocation5 + $0x1ec] ss:$16 sps:$4 sm:$0xff]   ;;  %v2326_v63 = vld [vmem:[#allocation5 + $0x1e0] ss:$16 sps:$4 sm:$0xff]   ;;  %v2327_v0 = vld [vmem:[#allocation5 + $0x1e8] ss:$16 sps:$4 sm:$0xff]  }
  0x4e   :  { %560 = vmatpush1.bf16.msra.mxu0 %v2266_v22  ;;  %673 = vmatpush1.bf16.msra.mxu1 %v2267_v23  ;;  %v2328_v1 = vld [vmem:[#allocation2] ss:$8 sps:$4 sm:$0xff]   ;;  %v2331_v2 = vld [vmem:[#allocation2 + $0x14] ss:$8 sps:$4 sm:$0xff]   ;;  %v2333_v3 = vld [vmem:[#allocation2 + $0x10] ss:$8 sps:$4 sm:$0xff]  }
  0x4f   :  { %561 = vmatprep.subr.bf16.mxu0 %v2268_v24  ;;  %674 = vmatprep.subr.bf16.mxu1 %v2270_v25  ;;  %v2334_v4 = vld [vmem:[#allocation2 + $0x24] ss:$8 sps:$4 sm:$0xff]   ;;  %v2336_v5 = vld [vmem:[#allocation2 + $0x20] ss:$8 sps:$4 sm:$0xff]   ;;  %v2337_v6 = vld [vmem:[#allocation2 + $0x34] ss:$8 sps:$4 sm:$0xff]  }
  0x50   :  { %v2339_v7 = vld [vmem:[#allocation2 + $0x30] ss:$8 sps:$4 sm:$0xff]   ;;  %v2340_v8 = vld [vmem:[#allocation2 + $0x44] ss:$8 sps:$4 sm:$0xff]   ;;  %v2342_v9 = vld [vmem:[#allocation2 + $0x40] ss:$8 sps:$4 sm:$0xff]  }
  0x51   :  { %v2343_v10 = vld [vmem:[#allocation2 + $0x54] ss:$8 sps:$4 sm:$0xff]   ;;  %v2345_v11 = vld [vmem:[#allocation2 + $0x50] ss:$8 sps:$4 sm:$0xff]   ;;  %v2346_v12 = vld [vmem:[#allocation2 + $0x64] ss:$8 sps:$4 sm:$0xff]  }
  0x52   :  { %562 = vmatpush1.bf16.msra.mxu0 %v2272_v26  ;;  %675 = vmatpush1.bf16.msra.mxu1 %v2273_v27  ;;  %v2348_v13 = vld [vmem:[#allocation2 + $0x60] ss:$8 sps:$4 sm:$0xff]   ;;  %v2349_v14 = vld [vmem:[#allocation2 + $0x74] ss:$8 sps:$4 sm:$0xff]   ;;  %v2351_v15 = vld [vmem:[#allocation2 + $0x70] ss:$8 sps:$4 sm:$0xff]  }
  0x53   :  { %563 = vmatprep.subr.bf16.mxu0 %v2274_v28  ;;  %676 = vmatprep.subr.bf16.mxu1 %v2276_v29  ;;  %v2352_v16 = vld [vmem:[#allocation7 + $0x40] sm:$0xff]   ;;  %v2356_v20 = vld [vmem:[#allocation7 + $0x48] sm:$0xff]   ;;  %v2360_v24 = vld [vmem:[#allocation7 + $0x50] sm:$0xff]  }
  0x54   :  { %v2353_v17 = vld [vmem:[#allocation7 + $0xc0] sm:$0xff]   ;;  %v2357_v21 = vld [vmem:[#allocation7 + $0xc8] sm:$0xff]   ;;  %v2361_v25 = vld [vmem:[#allocation7 + $0xd0] sm:$0xff]  }
  0x55   :  { %v2354_v18 = vld [vmem:[#allocation7] sm:$0xff]   ;;  %v2358_v22 = vld [vmem:[#allocation7 + $0x8] sm:$0xff]   ;;  %v2362_v26 = vld [vmem:[#allocation7 + $0x10] sm:$0xff]  }
  0x56   :  { %564 = vmatpush1.bf16.msra.mxu0 %v2278_v30  ;;  %677 = vmatpush1.bf16.msra.mxu1 %v2279_v31  ;;  %v2355_v19 = vld [vmem:[#allocation7 + $0x80] sm:$0xff]   ;;  %v2359_v23 = vld [vmem:[#allocation7 + $0x88] sm:$0xff]   ;;  %v2363_v27 = vld [vmem:[#allocation7 + $0x90] sm:$0xff]  }
  0x57   :  { %565 = vmatprep.subr.bf16.mxu0 %v2280_v32  ;;  %678 = vmatprep.subr.bf16.mxu1 %v2282_v33  ;;  %v2364_v28 = vld [vmem:[#allocation7 + $0x58] sm:$0xff]   ;;  %v2368_v32 = vld [vmem:[#allocation7 + $0x60] sm:$0xff]  }
  0x58   :  { %v2365_v29 = vld [vmem:[#allocation7 + $0xd8] sm:$0xff]   ;;  %v2369_v33 = vld [vmem:[#allocation7 + $0xe0] sm:$0xff]  }
  0x59   :  { %v2366_v30 = vld [vmem:[#allocation7 + $0x18] sm:$0xff]  }
  0x5a   :  { %566 = vmatpush1.bf16.msra.mxu0 %v2284_v34  ;;  %679 = vmatpush1.bf16.msra.mxu1 %v2285_v35  ;;  %v2367_v31 = vld [vmem:[#allocation7 + $0x98] sm:$0xff]   ;;  %v2370_v34 = vld [vmem:[#allocation7 + $0x20] sm:$0xff]  }
  0x5b   :  { %567 = vmatprep.subr.bf16.mxu0 %v2286_v36  ;;  %680 = vmatprep.subr.bf16.mxu1 %v2288_v37  ;;  %v2371_v35 = vld [vmem:[#allocation7 + $0xa0] sm:$0xff]   ;;  %v2372_v36 = vld [vmem:[#allocation7 + $0x68] sm:$0xff]  }
  0x5c   :  { %v2373_v37 = vld [vmem:[#allocation7 + $0xe8] sm:$0xff]  }
  0x5e   :  { %568 = vmatpush1.bf16.msra.mxu0 %v2290_v38  ;;  %681 = vmatpush1.bf16.msra.mxu1 %v2291_v39  ;;  %v2374_v38 = vld [vmem:[#allocation7 + $0x28] sm:$0xff]  }
  0x5f   :  { %569 = vmatprep.subr.bf16.mxu0 %v2292_v40  ;;  %682 = vmatprep.subr.bf16.mxu1 %v2294_v41  ;;  %v2375_v39 = vld [vmem:[#allocation7 + $0xa8] sm:$0xff]   ;;  %v2376_v40 = vld [vmem:[#allocation7 + $0x70] sm:$0xff]  }
  0x60   :  { %v2377_v41 = vld [vmem:[#allocation7 + $0xf0] sm:$0xff]  }
  0x62   :  { %570 = vmatpush1.bf16.msra.mxu0 %v2296_v42  ;;  %683 = vmatpush1.bf16.msra.mxu1 %v2297_v43  ;;  %v2378_v42 = vld [vmem:[#allocation7 + $0x30] sm:$0xff]  }
  0x63   :  { %571 = vmatprep.subr.bf16.mxu0 %v2298_v44  ;;  %684 = vmatprep.subr.bf16.mxu1 %v2300_v45  ;;  %v2379_v43 = vld [vmem:[#allocation7 + $0xb0] sm:$0xff]   ;;  %v2380_v44 = vld [vmem:[#allocation7 + $0x78] sm:$0xff]  }
  0x64   :  { %v2381_v45 = vld [vmem:[#allocation7 + $0xf8] sm:$0xff]  }
  0x66   :  { %572 = vmatpush1.bf16.msra.mxu0 %v2302_v46  ;;  %685 = vmatpush1.bf16.msra.mxu1 %v2303_v47  ;;  %v2382_v46 = vld [vmem:[#allocation7 + $0x38] sm:$0xff]  }
  0x67   :  { %573 = vmatprep.subr.bf16.mxu0 %v2304_v49  ;;  %686 = vmatprep.subr.bf16.mxu1 %v2306_v50  ;;  %v2383_v47 = vld [vmem:[#allocation7 + $0xb8] sm:$0xff]  }
  0x6a   :  { %574 = vmatpush1.bf16.msra.mxu0 %v2308_v51  ;;  %687 = vmatpush1.bf16.msra.mxu1 %v2309_v52 }
  0x6b   :  { %575 = vmatprep.subr.bf16.mxu0 %v2310_v53  ;;  %688 = vmatprep.subr.bf16.mxu1 %v2312_v54 }
  0x6e   :  { %576 = vmatpush1.bf16.msra.mxu0 %v2314_v55  ;;  %689 = vmatpush1.bf16.msra.mxu1 %v2315_v56 }
  0x6f   :  { %577 = vmatprep.subr.bf16.mxu0 %v2316_v57  ;;  %690 = vmatprep.subr.bf16.mxu1 %v2318_v58 }
  0x72   :  { %578 = vmatpush1.bf16.msra.mxu0 %v2320_v59  ;;  %691 = vmatpush1.bf16.msra.mxu1 %v2321_v60 }
  0x73   :  { %579 = vmatprep.subr.bf16.mxu0 %v2322_v61  ;;  %692 = vmatprep.subr.bf16.mxu1 %v2324_v62 }
  0x76   :  { %580 = vmatpush1.bf16.msra.mxu0 %v2326_v63  ;;  %693 = vmatpush1.bf16.msra.mxu1 %v2327_v0 }
  0x77   :  { %2093 = vmatprep.subr.bf16.mxu0 %v2352_v16  ;;  %2157 = vmatprep.subr.bf16.mxu1 %v2353_v17 }
  0x79   :  { %582 = vmatmul.mubr.bf16.vlgmr.msra.gmra.mrb[0].mxu0 %v2328_v1  ;;  %695 = vmatmul.mubr.bf16.vlgmr.msra.gmra.mrb[0].mxu1 %v2328_v1 }
  0x7a   :  { %591 = vmatprep.mubr.bf16.mxu0 %v2331_v2  ;;  %704 = vmatprep.mubr.bf16.mxu1 %v2331_v2 }
  0x7b   :  { %2094 = vmatpush3.bf16.msra.mxu0 %v2354_v18  ;;  %2158 = vmatpush3.bf16.msra.mxu1 %v2355_v19 }
  0x7c   :  { %2095 = vmatprep.subr.bf16.mxu0 %v2356_v20  ;;  %2159 = vmatprep.subr.bf16.mxu1 %v2357_v21 }
  0x7f   :  { %2096 = vmatpush3.bf16.msra.mxu0 %v2358_v22  ;;  %2160 = vmatpush3.bf16.msra.mxu1 %v2359_v23 }
  0x80   :  { %2097 = vmatprep.subr.bf16.mxu0 %v2360_v24  ;;  %2161 = vmatprep.subr.bf16.mxu1 %v2361_v25 }
  0x81   :  { %592 = vmatmul.mubr.bf16.gmra.mrb[4].mxu0 %v2333_v3  ;;  %705 = vmatmul.mubr.bf16.gmra.mrb[4].mxu1 %v2333_v3 }
  0x82   :  { %601 = vmatprep.mubr.bf16.mxu0 %v2334_v4  ;;  %714 = vmatprep.mubr.bf16.mxu1 %v2334_v4 }
  0x83   :  { %2098 = vmatpush3.bf16.msra.mxu0 %v2362_v26  ;;  %2162 = vmatpush3.bf16.msra.mxu1 %v2363_v27 }
  0x84   :  { %2099 = vmatprep.subr.bf16.mxu0 %v2364_v28  ;;  %2163 = vmatprep.subr.bf16.mxu1 %v2365_v29 }
  0x87   :  { %2100 = vmatpush3.bf16.msra.mxu0 %v2366_v30  ;;  %2164 = vmatpush3.bf16.msra.mxu1 %v2367_v31 }
  0x88   :  { %2101 = vmatprep.subr.bf16.mxu0 %v2368_v32  ;;  %2165 = vmatprep.subr.bf16.mxu1 %v2369_v33 }
  0x89   :  { %602 = vmatmul.mubr.bf16.gmra.mrb[8].mxu0 %v2336_v5  ;;  %715 = vmatmul.mubr.bf16.gmra.mrb[8].mxu1 %v2336_v5 }
  0x8a   :  { %611 = vmatprep.mubr.bf16.mxu0 %v2337_v6  ;;  %724 = vmatprep.mubr.bf16.mxu1 %v2337_v6 }
  0x8b   :  { %2102 = vmatpush3.bf16.msra.mxu0 %v2370_v34  ;;  %2166 = vmatpush3.bf16.msra.mxu1 %v2371_v35 }
  0x8c   :  { %2103 = vmatprep.subr.bf16.mxu0 %v2372_v36  ;;  %2167 = vmatprep.subr.bf16.mxu1 %v2373_v37 }
  0x8f   :  { %2104 = vmatpush3.bf16.msra.mxu0 %v2374_v38  ;;  %2168 = vmatpush3.bf16.msra.mxu1 %v2375_v39 }
  0x90   :  { %2105 = vmatprep.subr.bf16.mxu0 %v2376_v40  ;;  %2169 = vmatprep.subr.bf16.mxu1 %v2377_v41 }
  0x91   :  { %612 = vmatmul.mubr.bf16.gmra.mrb[12].mxu0 %v2339_v7  ;;  %725 = vmatmul.mubr.bf16.gmra.mrb[12].mxu1 %v2339_v7 }
  0x92   :  { %621 = vmatprep.mubr.bf16.mxu0 %v2340_v8  ;;  %734 = vmatprep.mubr.bf16.mxu1 %v2340_v8 }
  0x93   :  { %2106 = vmatpush3.bf16.msra.mxu0 %v2378_v42  ;;  %2170 = vmatpush3.bf16.msra.mxu1 %v2379_v43 }
  0x94   :  { %2107 = vmatprep.subr.bf16.mxu0 %v2380_v44  ;;  %2171 = vmatprep.subr.bf16.mxu1 %v2381_v45 }
  0x97   :  { %2108 = vmatpush3.bf16.msra.mxu0 %v2382_v46  ;;  %2172 = vmatpush3.bf16.msra.mxu1 %v2383_v47 }
  0x99   :  { %622 = vmatmul.mubr.bf16.gmra.mrb[16].mxu0 %v2342_v9  ;;  %735 = vmatmul.mubr.bf16.gmra.mrb[16].mxu1 %v2342_v9 }
  0x9a   :  { %631 = vmatprep.mubr.bf16.mxu0 %v2343_v10  ;;  %744 = vmatprep.mubr.bf16.mxu1 %v2343_v10 }
  0xa1   :  { %632 = vmatmul.mubr.bf16.gmra.mrb[20].mxu0 %v2345_v11  ;;  %745 = vmatmul.mubr.bf16.gmra.mrb[20].mxu1 %v2345_v11 }
  0xa2   :  { %641 = vmatprep.mubr.bf16.mxu0 %v2346_v12  ;;  %754 = vmatprep.mubr.bf16.mxu1 %v2346_v12 }
  0xa9   :  { %642 = vmatmul.mubr.bf16.gmra.mrb[24].mxu0 %v2348_v13  ;;  %755 = vmatmul.mubr.bf16.gmra.mrb[24].mxu1 %v2348_v13 }
  0xaa   :  { %651 = vmatprep.mubr.bf16.mxu0 %v2349_v14  ;;  %764 = vmatprep.mubr.bf16.mxu1 %v2349_v14 }
  0xb1   :  { %652 = vmatmul.mubr.bf16.gmra.mrb[28].mxu0 %v2351_v15  ;;  %765 = vmatmul.mubr.bf16.gmra.mrb[28].mxu1 %v2351_v15 }
 0x14c   :  { %v2578_v48 = vpop.f32.mrb[0].mxu0  ;;  %v2580_v49 = vpop.f32.mrb[0].mxu1 }
 0x14d   :  { %v2582_v50 = vpop.f32.mrb[1].mxu0  ;;  %v2584_v51 = vpop.f32.mrb[1].mxu1  ;;  %v859_v52 = vmul.f32 %v2578_v48, %v2578_v48  ;;  %v861_v53 = vmul.f32 %v2580_v49, %v2580_v49 }
 0x14e   :  { %v860_v54 = vmul.f32 %v2582_v50, %v2582_v50  ;;  %v862_v55 = vmul.f32 %v2584_v51, %v2584_v51  ;;  %v2594_v56 = vpop.f32.mrb[2].mxu0  ;;  %v2596_v57 = vpop.f32.mrb[2].mxu1 }
 0x14f   :  { %v775_v58 = vadd.f32 %v2594_v56, %v2578_v48  ;;  %v863_v59 = vmul.f32 %v2594_v56, %v2594_v56  ;;  %v817_v60 = vadd.f32 %v2596_v57, %v2580_v49  ;;  %v865_v61 = vmul.f32 %v2596_v57, %v2596_v57  ;;  %v2606_v62 = vpop.f32.mrb[3].mxu0  ;;  %v2608_v63 = vpop.f32.mrb[3].mxu1 }
 0x150   :  { %v796_v0 = vadd.f32 %v2606_v62, %v2582_v50  ;;  %v864_v1 = vmul.f32 %v2606_v62, %v2606_v62  ;;  %v838_v2 = vadd.f32 %v2608_v63, %v2584_v51  ;;  %v866_v3 = vmul.f32 %v2608_v63, %v2608_v63 }
 0x151   :  { %v923_v4 = vadd.f32 %v863_v59, %v859_v52  ;;  %v965_v5 = vadd.f32 %v865_v61, %v861_v53 }
 0x152   :  { %v944_v6 = vadd.f32 %v864_v1, %v860_v54  ;;  %v986_v7 = vadd.f32 %v866_v3, %v862_v55 }
 0x154   :  { %v2618_v8 = vpop.f32.mrb[4].mxu0  ;;  %v2620_v9 = vpop.f32.mrb[4].mxu1 }
 0x155   :  { %v776_v10 = vadd.f32 %v775_v58, %v2618_v8  ;;  %v867_v11 = vmul.f32 %v2618_v8, %v2618_v8  ;;  %v818_v12 = vadd.f32 %v817_v60, %v2620_v9  ;;  %v869_v13 = vmul.f32 %v2620_v9, %v2620_v9  ;;  %v2628_v14 = vpop.f32.mrb[5].mxu0  ;;  %v2630_v15 = vpop.f32.mrb[5].mxu1 }
 0x156   :  { %v797_v16 = vadd.f32 %v796_v0, %v2628_v14  ;;  %v868_v17 = vmul.f32 %v2628_v14, %v2628_v14  ;;  %v839_v18 = vadd.f32 %v838_v2, %v2630_v15  ;;  %v870_v19 = vmul.f32 %v2630_v15, %v2630_v15  ;;  %v2638_v20 = vpop.f32.mrb[6].mxu0  ;;  %v2640_v21 = vpop.f32.mrb[6].mxu1 }
 0x157   :  { %v924_v22 = vadd.f32 %v923_v4, %v867_v11  ;;  %v966_v23 = vadd.f32 %v965_v5, %v869_v13  ;;  %v777_v24 = vadd.f32 %v776_v10, %v2638_v20  ;;  %v871_v25 = vmul.f32 %v2638_v20, %v2638_v20  ;;  %v2645_v26 = vpop.f32.mrb[7].mxu0  ;;  %v2647_v27 = vpop.f32.mrb[7].mxu1 }
 0x158   :  { %v945_v28 = vadd.f32 %v944_v6, %v868_v17  ;;  %v987_v29 = vadd.f32 %v986_v7, %v870_v19  ;;  %v819_v30 = vadd.f32 %v818_v12, %v2640_v21  ;;  %v873_v31 = vmul.f32 %v2640_v21, %v2640_v21 }
 0x159   :  { %v925_v32 = vadd.f32 %v924_v22, %v871_v25  ;;  %v798_v33 = vadd.f32 %v797_v16, %v2645_v26  ;;  %v872_v34 = vmul.f32 %v2645_v26, %v2645_v26  ;;  %v840_v35 = vadd.f32 %v839_v18, %v2647_v27 }
 0x15a   :  { %v967_v36 = vadd.f32 %v966_v23, %v873_v31  ;;  %v874_v37 = vmul.f32 %v2647_v27, %v2647_v27 }
 0x15b   :  { %v946_v38 = vadd.f32 %v945_v28, %v872_v34 }
 0x15c   :  { %v988_v39 = vadd.f32 %v987_v29, %v874_v37  ;;  %v2658_v40 = vpop.f32.mrb[8].mxu0  ;;  %v2660_v41 = vpop.f32.mrb[8].mxu1 }
 0x15d   :  { %v778_v42 = vadd.f32 %v777_v24, %v2658_v40  ;;  %v875_v43 = vmul.f32 %v2658_v40, %v2658_v40  ;;  %v820_v44 = vadd.f32 %v819_v30, %v2660_v41  ;;  %v877_v45 = vmul.f32 %v2660_v41, %v2660_v41  ;;  %v2668_v46 = vpop.f32.mrb[9].mxu0  ;;  %v2670_v47 = vpop.f32.mrb[9].mxu1 }
 0x15e   :  { %v799_v52 = vadd.f32 %v798_v33, %v2668_v46  ;;  %v876_v53 = vmul.f32 %v2668_v46, %v2668_v46  ;;  %v841_v54 = vadd.f32 %v840_v35, %v2670_v47  ;;  %v878_v55 = vmul.f32 %v2670_v47, %v2670_v47  ;;  %v2678_v58 = vpop.f32.mrb[10].mxu0  ;;  %v2680_v59 = vpop.f32.mrb[10].mxu1 }
 0x15f   :  { %v926_v60 = vadd.f32 %v925_v32, %v875_v43  ;;  %v968_v61 = vadd.f32 %v967_v36, %v877_v45  ;;  %v779_v0 = vadd.f32 %v778_v42, %v2678_v58  ;;  %v879_v1 = vmul.f32 %v2678_v58, %v2678_v58  ;;  %v2685_v2 = vpop.f32.mrb[11].mxu0  ;;  %v2687_v3 = vpop.f32.mrb[11].mxu1 }
 0x160   :  { %v947_v4 = vadd.f32 %v946_v38, %v876_v53  ;;  %v989_v5 = vadd.f32 %v988_v39, %v878_v55  ;;  %v821_v6 = vadd.f32 %v820_v44, %v2680_v59  ;;  %v881_v7 = vmul.f32 %v2680_v59, %v2680_v59 }
 0x161   :  { %v927_v10 = vadd.f32 %v926_v60, %v879_v1  ;;  %v800_v11 = vadd.f32 %v799_v52, %v2685_v2  ;;  %v880_v12 = vmul.f32 %v2685_v2, %v2685_v2  ;;  %v842_v13 = vadd.f32 %v841_v54, %v2687_v3 }
 0x162   :  { %v969_v16 = vadd.f32 %v968_v61, %v881_v7  ;;  %v882_v17 = vmul.f32 %v2687_v3, %v2687_v3 }
 0x163   :  { %v948_v18 = vadd.f32 %v947_v4, %v880_v12 }
 0x164   :  { %v990_v19 = vadd.f32 %v989_v5, %v882_v17  ;;  %v2698_v22 = vpop.f32.mrb[12].mxu0  ;;  %v2700_v23 = vpop.f32.mrb[12].mxu1 }
 0x165   :  { %3364 = vst [vmem:[#allocation12_spill] sm:$0xff] %v2700_v23  ;;  %v780_v24 = vadd.f32 %v779_v0, %v2698_v22  ;;  %v883_v25 = vmul.f32 %v2698_v22, %v2698_v22  ;;  %v822_v28 = vadd.f32 %v821_v6, %v2700_v23  ;;  %v885_v29 = vmul.f32 %v2700_v23, %v2700_v23  ;;  %v2708_v30 = vpop.f32.mrb[13].mxu0  ;;  %v2710_v31 = vpop.f32.mrb[13].mxu1 }
 0x166   :  { %v801_v32 = vadd.f32 %v800_v11, %v2708_v30  ;;  %v884_v33 = vmul.f32 %v2708_v30, %v2708_v30  ;;  %v843_v34 = vadd.f32 %v842_v13, %v2710_v31  ;;  %v886_v35 = vmul.f32 %v2710_v31, %v2710_v31  ;;  %v2718_v36 = vpop.f32.mrb[14].mxu0  ;;  %v2720_v37 = vpop.f32.mrb[14].mxu1 }
 0x167   :  { %3365 = vst [vmem:[#allocation13_spill] sm:$0xff] %v2720_v37  ;;  %v928_v38 = vadd.f32 %v927_v10, %v883_v25  ;;  %v970_v39 = vadd.f32 %v969_v16, %v885_v29  ;;  %v781_v42 = vadd.f32 %v780_v24, %v2718_v36  ;;  %v887_v43 = vmul.f32 %v2718_v36, %v2718_v36  ;;  %v2725_v44 = vpop.f32.mrb[15].mxu0  ;;  %v2727_v45 = vpop.f32.mrb[15].mxu1 }
 0x168   :  { %v949_v52 = vadd.f32 %v948_v18, %v884_v33  ;;  %v991_v53 = vadd.f32 %v990_v19, %v886_v35  ;;  %v823_v54 = vadd.f32 %v822_v28, %v2720_v37  ;;  %v889_v55 = vmul.f32 %v2720_v37, %v2720_v37 }
 0x169   :  { %v929_v60 = vadd.f32 %v928_v38, %v887_v43  ;;  %v802_v61 = vadd.f32 %v801_v32, %v2725_v44  ;;  %v888_v0 = vmul.f32 %v2725_v44, %v2725_v44  ;;  %v844_v1 = vadd.f32 %v843_v34, %v2727_v45 }
 0x16a   :  { %v971_v4 = vadd.f32 %v970_v39, %v889_v55  ;;  %v890_v5 = vmul.f32 %v2727_v45, %v2727_v45 }
 0x16b   :  { %v950_v6 = vadd.f32 %v949_v52, %v888_v0 }
 0x16c   :  { %v992_v7 = vadd.f32 %v991_v53, %v890_v5  ;;  %v2738_v10 = vpop.f32.mrb[16].mxu0  ;;  %v2740_v11 = vpop.f32.mrb[16].mxu1 }
 0x16d   :  { %3366 = vst [vmem:[#allocation14_spill] sm:$0xff] %v2738_v10  ;;  %3367 = vst [vmem:[#allocation15_spill] sm:$0xff] %v2740_v11  ;;  %v782_v12 = vadd.f32 %v781_v42, %v2738_v10  ;;  %v891_v13 = vmul.f32 %v2738_v10, %v2738_v10  ;;  %v824_v16 = vadd.f32 %v823_v54, %v2740_v11  ;;  %v2748_v18 = vpop.f32.mrb[17].mxu0  ;;  %v2750_v19 = vpop.f32.mrb[17].mxu1 }
 0x16e   :  { %v893_v17 = vmul.f32 %v2740_v11, %v2740_v11  ;;  %3368 = vst [vmem:[#allocation16_spill] sm:$0xff] %v2748_v18  ;;  %3369 = vst [vmem:[#allocation17_spill] sm:$0xff] %v2750_v19  ;;  %v803_v24 = vadd.f32 %v802_v61, %v2748_v18  ;;  %v892_v25 = vmul.f32 %v2748_v18, %v2748_v18  ;;  %v2758_v32 = vpop.f32.mrb[18].mxu0  ;;  %v2760_v33 = vpop.f32.mrb[18].mxu1 }
 0x16f   :  { %v845_v28 = vadd.f32 %v844_v1, %v2750_v19  ;;  %v894_v29 = vmul.f32 %v2750_v19, %v2750_v19  ;;  %3370 = vst [vmem:[#allocation18_spill] sm:$0xff] %v2758_v32  ;;  %3371 = vst [vmem:[#allocation19_spill] sm:$0xff] %v2760_v33  ;;  %v930_v34 = vadd.f32 %v929_v60, %v891_v13  ;;  %v2765_v42 = vpop.f32.mrb[19].mxu0  ;;  %v2767_v43 = vpop.f32.mrb[19].mxu1 }
 0x170   :  { %v972_v35 = vadd.f32 %v971_v4, %v893_v17  ;;  %v783_v38 = vadd.f32 %v782_v12, %v2758_v32  ;;  %v895_v39 = vmul.f32 %v2758_v32, %v2758_v32  ;;  %3372 = vst [vmem:[#allocation20_spill] sm:$0xff] %v2765_v42  ;;  %3373 = vst [vmem:[#allocation21_spill] sm:$0xff] %v2767_v43 }
 0x171   :  { %v951_v52 = vadd.f32 %v950_v6, %v892_v25  ;;  %v993_v53 = vadd.f32 %v992_v7, %v894_v29  ;;  %v825_v54 = vadd.f32 %v824_v16, %v2760_v33  ;;  %v897_v55 = vmul.f32 %v2760_v33, %v2760_v33 }
 0x172   :  { %v931_v61 = vadd.f32 %v930_v34, %v895_v39  ;;  %v804_v60 = vadd.f32 %v803_v24, %v2765_v42  ;;  %v896_v0 = vmul.f32 %v2765_v42, %v2765_v42  ;;  %v846_v1 = vadd.f32 %v845_v28, %v2767_v43 }
 0x173   :  { %v973_v4 = vadd.f32 %v972_v35, %v897_v55  ;;  %v898_v5 = vmul.f32 %v2767_v43, %v2767_v43 }
 0x174   :  { %v952_v12 = vadd.f32 %v951_v52, %v896_v0  ;;  %v2778_v7 = vpop.f32.mrb[20].mxu0  ;;  %v2780_v13 = vpop.f32.mrb[20].mxu1 }
 0x175   :  { %v994_v6 = vadd.f32 %v993_v53, %v898_v5  ;;  %3374 = vst [vmem:[#allocation22_spill] sm:$0xff] %v2778_v7  ;;  %3375 = vst [vmem:[#allocation23_spill] sm:$0xff] %v2780_v13  ;;  %v784_v16 = vadd.f32 %v783_v38, %v2778_v7  ;;  %v899_v17 = vmul.f32 %v2778_v7, %v2778_v7  ;;  %v2788_v28 = vpop.f32.mrb[21].mxu0  ;;  %v2790_v29 = vpop.f32.mrb[21].mxu1 }
 0x176   :  { %v826_v24 = vadd.f32 %v825_v54, %v2780_v13  ;;  %v901_v25 = vmul.f32 %v2780_v13, %v2780_v13  ;;  %3376 = vst [vmem:[#allocation24_spill] sm:$0xff] %v2788_v28  ;;  %3377 = vst [vmem:[#allocation25_spill] sm:$0xff] %v2790_v29  ;;  %v805_v34 = vadd.f32 %v804_v60, %v2788_v28  ;;  %v2798_v52 = vpop.f32.mrb[22].mxu0  ;;  %v2800_v53 = vpop.f32.mrb[22].mxu1 }
 0x177   :  { %v900_v35 = vmul.f32 %v2788_v28, %v2788_v28  ;;  %v847_v39 = vadd.f32 %v846_v1, %v2790_v29  ;;  %v902_v38 = vmul.f32 %v2790_v29, %v2790_v29  ;;  %3378 = vst [vmem:[#allocation26_spill] sm:$0xff] %v2798_v52  ;;  %3379 = vst [vmem:[#allocation27_spill] sm:$0xff] %v2800_v53  ;;  %v2805_v60 = vpop.f32.mrb[23].mxu0  ;;  %v2807_v13 = vpop.f32.mrb[23].mxu1 }
 0x178   :  { %v932_v54 = vadd.f32 %v931_v61, %v899_v17  ;;  %v974_v55 = vadd.f32 %v973_v4, %v901_v25  ;;  %v785_v0 = vadd.f32 %v784_v16, %v2798_v52  ;;  %v903_v5 = vmul.f32 %v2798_v52, %v2798_v52  ;;  %3380 = vst [vmem:[#allocation28_spill] sm:$0xff] %v2805_v60 }
 0x179   :  { %3381 = vst [vmem:[#allocation29_spill] sm:$0xff] %v2807_v13  ;;  %v953_v7 = vadd.f32 %v952_v12, %v900_v35  ;;  %v995_v1 = vadd.f32 %v994_v6, %v902_v38  ;;  %v827_v28 = vadd.f32 %v826_v24, %v2800_v53  ;;  %v905_v29 = vmul.f32 %v2800_v53, %v2800_v53 }
 0x17a   :  { %v933_v33 = vadd.f32 %v932_v54, %v903_v5  ;;  %v806_v61 = vadd.f32 %v805_v34, %v2805_v60  ;;  %v904_v4 = vmul.f32 %v2805_v60, %v2805_v60  ;;  %v848_v16 = vadd.f32 %v847_v39, %v2807_v13 }
 0x17b   :  { %v975_v17 = vadd.f32 %v974_v55, %v905_v29  ;;  %v906_v25 = vmul.f32 %v2807_v13, %v2807_v13 }
 0x17c   :  { %v954_v52 = vadd.f32 %v953_v7, %v904_v4  ;;  %v2818_v6 = vpop.f32.mrb[24].mxu0  ;;  %v2820_v24 = vpop.f32.mrb[24].mxu1 }
 0x17d   :  { %v996_v12 = vadd.f32 %v995_v1, %v906_v25  ;;  %3382 = vst [vmem:[#allocation30_spill] sm:$0xff] %v2818_v6  ;;  %3383 = vst [vmem:[#allocation31_spill] sm:$0xff] %v2820_v24  ;;  %v786_v35 = vadd.f32 %v785_v0, %v2818_v6  ;;  %v907_v34 = vmul.f32 %v2818_v6, %v2818_v6  ;;  %v2828_v29 = vpop.f32.mrb[25].mxu0  ;;  %v2830_v54 = vpop.f32.mrb[25].mxu1 }
 0x17e   :  { %v828_v38 = vadd.f32 %v827_v28, %v2820_v24  ;;  %v909_v39 = vmul.f32 %v2820_v24, %v2820_v24  ;;  %3384 = vst [vmem:[#allocation32_spill] sm:$0xff] %v2828_v29  ;;  %3385 = vst [vmem:[#allocation33_spill] sm:$0xff] %v2830_v54  ;;  %v807_v7 = vadd.f32 %v806_v61, %v2828_v29  ;;  %v2838_v1 = vpop.f32.mrb[26].mxu0  ;;  %v2840_v28 = vpop.f32.mrb[26].mxu1 }
 0x17f   :  { %v908_v55 = vmul.f32 %v2828_v29, %v2828_v29  ;;  %v849_v5 = vadd.f32 %v848_v16, %v2830_v54  ;;  %v910_v0 = vmul.f32 %v2830_v54, %v2830_v54  ;;  %3386 = vst [vmem:[#allocation34_spill] sm:$0xff] %v2838_v1  ;;  %3387 = vst [vmem:[#allocation35_spill] sm:$0xff] %v2840_v28  ;;  %v2845_v61 = vpop.f32.mrb[27].mxu0  ;;  %v2847_v53 = vpop.f32.mrb[27].mxu1 }
 0x180   :  { %v934_v4 = vadd.f32 %v933_v33, %v907_v34  ;;  %v976_v25 = vadd.f32 %v975_v17, %v909_v39  ;;  %v787_v24 = vadd.f32 %v786_v35, %v2838_v1  ;;  %v911_v6 = vmul.f32 %v2838_v1, %v2838_v1  ;;  %3388 = vst [vmem:[#allocation36_spill] sm:$0xff] %v2845_v61 }
 0x181   :  { %3389 = vst [vmem:[#allocation37_spill] sm:$0xff] %v2847_v53  ;;  %v955_v29 = vadd.f32 %v954_v52, %v908_v55  ;;  %v997_v16 = vadd.f32 %v996_v12, %v910_v0  ;;  %v829_v13 = vadd.f32 %v828_v38, %v2840_v28  ;;  %v913_v54 = vmul.f32 %v2840_v28, %v2840_v28 }
 0x182   :  { %v935_v60 = vadd.f32 %v934_v4, %v911_v6  ;;  %v808_v33 = vadd.f32 %v807_v7, %v2845_v61  ;;  %v912_v17 = vmul.f32 %v2845_v61, %v2845_v61  ;;  %v850_v35 = vadd.f32 %v849_v5, %v2847_v53 }
 0x183   :  { %v977_v34 = vadd.f32 %v976_v25, %v913_v54  ;;  %v914_v39 = vmul.f32 %v2847_v53, %v2847_v53 }
 0x184   :  { %v956_v1 = vadd.f32 %v955_v29, %v912_v17  ;;  %v2858_v12 = vpop.f32.mrb[28].mxu0  ;;  %v2860_v38 = vpop.f32.mrb[28].mxu1 }
 0x185   :  { %v998_v52 = vadd.f32 %v997_v16, %v914_v39  ;;  %3390 = vst [vmem:[#allocation38_spill] sm:$0xff] %v2858_v12  ;;  %3391 = vst [vmem:[#allocation39_spill] sm:$0xff] %v2860_v38  ;;  %v788_v55 = vadd.f32 %v787_v24, %v2858_v12  ;;  %v915_v6 = vmul.f32 %v2858_v12, %v2858_v12  ;;  %v2868_v54 = vpop.f32.mrb[29].mxu0  ;;  %v2870_v0 = vpop.f32.mrb[29].mxu1 }
 0x186   :  { %v830_v7 = vadd.f32 %v829_v13, %v2860_v38  ;;  %v917_v5 = vmul.f32 %v2860_v38, %v2860_v38  ;;  %3392 = vst [vmem:[#allocation40_spill] sm:$0xff] %v2868_v54  ;;  %3393 = vst [vmem:[#allocation41_spill] sm:$0xff] %v2870_v0  ;;  %v809_v29 = vadd.f32 %v808_v33, %v2868_v54  ;;  %v2878_v16 = vpop.f32.mrb[30].mxu0  ;;  %v2880_v13 = vpop.f32.mrb[30].mxu1 }
 0x187   :  { %v916_v4 = vmul.f32 %v2868_v54, %v2868_v54  ;;  %v851_v25 = vadd.f32 %v850_v35, %v2870_v0  ;;  %v918_v24 = vmul.f32 %v2870_v0, %v2870_v0  ;;  %3394 = vst [vmem:[#allocation42_spill] sm:$0xff] %v2878_v16  ;;  %3395 = vst [vmem:[#allocation43_spill] sm:$0xff] %v2880_v13  ;;  %v2885_v33 = vpop.f32.mrb[31].mxu0  ;;  %v2887_v28 = vpop.f32.mrb[31].mxu1 }
 0x188   :  { %v936_v17 = vadd.f32 %v935_v60, %v915_v6  ;;  %v978_v39 = vadd.f32 %v977_v34, %v917_v5  ;;  %v789_v38 = vadd.f32 %v788_v55, %v2878_v16  ;;  %v919_v12 = vmul.f32 %v2878_v16, %v2878_v16  ;;  %3396 = vst [vmem:[#allocation44_spill] sm:$0xff] %v2885_v33 }
 0x189   :  { %v957_v54 = vadd.f32 %v956_v1, %v916_v4  ;;  %v999_v35 = vadd.f32 %v998_v52, %v918_v24  ;;  %v831_v53 = vadd.f32 %v830_v7, %v2880_v13  ;;  %v921_v0 = vmul.f32 %v2880_v13, %v2880_v13 }
 0x18a   :  { %v790_v61 = vrot.slane %v789_v38, 4  ;;  %v937_v11 = vadd.f32 %v936_v17, %v919_v12  ;;  %v810_v60 = vadd.f32 %v809_v29, %v2885_v33  ;;  %v920_v34 = vmul.f32 %v2885_v33, %v2885_v33 }
 0x18b   :  { %v832_v55 = vrot.slane %v831_v53, 4  ;;  %v979_v6 = vadd.f32 %v978_v39, %v921_v0  ;;  %v852_v5 = vadd.f32 %v851_v25, %v2887_v28  ;;  %v922_v1 = vmul.f32 %v2887_v28, %v2887_v28 }
 0x18c   :  { %v791_v52 = vadd.f32 %v790_v61, %v789_v38  ;;  %v938_v4 = vrot.slane %v937_v11, 4  ;;  %v811_v7 = vrot.slane %v810_v60, 4  ;;  %v958_v24 = vadd.f32 %v957_v54, %v920_v34 }
 0x18d   :  { %v833_v16 = vadd.f32 %v832_v55, %v831_v53  ;;  %v980_v13 = vrot.slane %v979_v6, 4  ;;  %v853_v32 = vrot.slane %v852_v5, 4  ;;  %v1000_v12 = vadd.f32 %v999_v35, %v922_v1 }
 0x18e   :  { %v792_v17 = vrot.slane %v791_v52, 2  ;;  %v939_v29 = vadd.f32 %v938_v4, %v937_v11  ;;  %v812_v10 = vadd.f32 %v811_v7, %v810_v60  ;;  %v959_v43 = vrot.slane %v958_v24, 4 }
 0x18f   :  { %v834_v33 = vrot.slane %v833_v16, 2  ;;  %v981_v19 = vadd.f32 %v980_v13, %v979_v6  ;;  %v854_v0 = vadd.f32 %v853_v32, %v852_v5  ;;  %v1001_v39 = vrot.slane %v1000_v12, 4 }
 0x190   :  { %v793_v25 = vadd.f32 %v792_v17, %v791_v52  ;;  %v940_v42 = vrot.slane %v939_v29, 2  ;;  %v813_v18 = vrot.slane %v812_v10, 2  ;;  %v960_v37 = vadd.f32 %v959_v43, %v958_v24 }
 0x191   :  { %v835_v61 = vadd.f32 %v834_v33, %v833_v16  ;;  %v982_v38 = vrot.slane %v981_v19, 2  ;;  %v855_v23 = vrot.slane %v854_v0, 2  ;;  %v1002_v54 = vadd.f32 %v1001_v39, %v1000_v12 }
 0x192   :  { %v794_v53 = vrot.slane %v793_v25, 1  ;;  %v941_v34 = vadd.f32 %v940_v42, %v939_v29  ;;  %v814_v55 = vadd.f32 %v813_v18, %v812_v10  ;;  %v961_v35 = vrot.slane %v960_v37, 2 }
 0x193   :  { %v836_v1 = vrot.slane %v835_v61, 1  ;;  %v983_v11 = vadd.f32 %v982_v38, %v981_v19  ;;  %v856_v60 = vadd.f32 %v855_v23, %v854_v0  ;;  %v1003_v4 = vrot.slane %v1002_v54, 2 }
 0x194   :  { %v795_v7 = vadd.f32 %v794_v53, %v793_v25  ;;  %v942_v13 = vrot.slane %v941_v34, 1  ;;  %v815_v32 = vrot.slane %v814_v55, 1  ;;  %v962_v6 = vadd.f32 %v961_v35, %v960_v37 }
 0x195   :  { %v837_v5 = vadd.f32 %v836_v1, %v835_v61  ;;  %v984_v52 = vrot.slane %v983_v11, 1  ;;  %v857_v17 = vrot.slane %v856_v60, 1  ;;  %v1004_v43 = vadd.f32 %v1003_v4, %v1002_v54 }
 0x196   :  { %v943_v16 = vadd.f32 %v942_v13, %v941_v34  ;;  %v1007_v33 = vmul.f32 0.0078125, %v795_v7  ;;  %v816_v24 = vadd.f32 %v815_v32, %v814_v55  ;;  %v963_v12 = vrot.slane %v962_v6, 1 }
 0x197   :  { %v985_v39 = vadd.f32 %v984_v52, %v983_v11  ;;  %v1009_v42 = vmul.f32 0.0078125, %v837_v5  ;;  %v858_v10 = vadd.f32 %v857_v17, %v856_v60  ;;  %v1005_v18 = vrot.slane %v1004_v43, 1 }
 0x198   :  { %v1011_v29 = vmul.f32 0.0078125, %v943_v16  ;;  %v1015_v19 = vmul.f32 %v1007_v33, %v1007_v33  ;;  %v964_v23 = vadd.f32 %v963_v12, %v962_v6  ;;  %v1008_v0 = vmul.f32 0.0078125, %v816_v24 }
 0x199   :  { %v1013_v25 = vmul.f32 0.0078125, %v985_v39  ;;  %v1017_v38 = vmul.f32 %v1009_v42, %v1009_v42  ;;  %v1006_v53 = vadd.f32 %v1005_v18, %v1004_v43  ;;  %v1010_v37 = vmul.f32 0.0078125, %v858_v10 }
 0x19a   :  { %v1019_v61 = vsub.f32 %v1011_v29, %v1015_v19  ;;  %v1012_v35 = vmul.f32 0.0078125, %v964_v23  ;;  %v1016_v1 = vmul.f32 %v1008_v0, %v1008_v0  ;;  %v2497_v43 = vmov 1966171168  }
 0x19b   :  { %v1021_v54 = vsub.f32 %v1013_v25, %v1017_v38  ;;  %v1014_v34 = vmul.f32 0.0078125, %v1006_v53  ;;  %v1018_v4 = vmul.f32 %v1010_v37, %v1010_v37  ;;  %v1043_v16 = vunpack.c.l.s4 %v2497_v43 }
 0x19c   :  { %v1023_v55 = vmax.f32 %v1019_v61, 0.0  ;;  %v1020_v7 = vsub.f32 %v1012_v35, %v1016_v1  ;;  %v1045_v24 = vlaneseq  ;;  %v1027_v1 = vld [vmem:[%s3323_s2] sm:$0xf] }
 0x19d   :  { %v1025_v11 = vmax.f32 %v1021_v54, 0.0  ;;  %v1022_v13 = vsub.f32 %v1014_v34, %v1018_v4  ;;  %v1044_v12 = vunpack.c.0.s8 %v1043_v16 }
 0x19e   :  { %v1028_v60 = vadd.f32 1e-05, %v1023_v55  ;;  %v1024_v32 = vmax.f32 %v1020_v7, 0.0  ;;  %v2898_v39 = vshrl.u32 %v1045_v24, 7 }
 0x19f   :  { %v1030_v5 = vadd.f32 1e-05, %v1025_v11  ;;  %v1026_v52 = vmax.f32 %v1022_v13, 0.0 }
 0x1a0   :  { %2384 = vrsqrt.f32 %v1028_v60  ;;  %v1029_v6 = vadd.f32 1e-05, %v1024_v32  ;;  %v1047_v29 = vsub.s32 %v1044_v12, %v2898_v39  ;;  %v2905_v54 = vsub.s32 0, %v2898_v39 }
 0x1a1   :  { %2386 = vrsqrt.f32 %v1030_v5  ;;  %v1031_v17 = vadd.f32 1e-05, %v1026_v52  ;;  %v1074_v4 = vsub.s32 1, %v2898_v39  ;;  %v1078_v55 = vsub.s32 2, %v2898_v39 }
 0x1a2   :  { %2388 = vrsqrt.f32 %v1029_v6  ;;  %3397 = vst [vmem:[#allocation45_spill] sm:$0xff] %v2905_v54  ;;  %v1082_v7 = vsub.s32 3, %v2898_v39 }
 0x1a3   :  { %2390 = vrsqrt.f32 %v1031_v17 }
 0x1aa   :  { %v2385_v10 = vpop.eup %2384 }
 0x1ab   :  { %v2387_v18 = vpop.eup %2386 }
 0x1ac   :  { %v2389_v19 = vpop.eup %2388 }
 0x1ad   :  { %v2391_v23 = vpop.eup %2390  ;;  %v1040_v25 = vcombine.low %v2385_v10, %v2389_v19 }
 0x1ae   :  { %v1041_v38 = vcombine.low %v2387_v18, %v2391_v23 }
 0x1af   :  { %v1048_v53 = vrot.slane %v1040_v25, %v1047_v29  ;;  %v3398_v25 = vld [vmem:[#allocation12_spill] sm:$0xff] }
 0x1b0   :  { %v1055_v61 = vrot.slane %v1041_v38, %v1047_v29  ;;  %v3399_v38 = vld [vmem:[#allocation13_spill] sm:$0xff] }
 0x1b2   :  { %v1056_v35 = vcombine.low %v1048_v53, %v1055_v61  ;;  %v3400_v53 = vld [vmem:[#allocation16_spill] sm:$0xff] }
 0x1b3   :  { %v3401_v61 = vld [vmem:[#allocation20_spill] sm:$0xff] }
 0x1b4   :  { %v1063_v34 = vrot.slane %v1056_v35, %v1047_v29  ;;  %v3402_v35 = vld [vmem:[#allocation17_spill] sm:$0xff] }
 0x1b6   :  { %v1065_v11 = vmul.f32 %v1063_v34, %v1027_v1  ;;  %v3403_v1 = vld [vmem:[#allocation21_spill] sm:$0xff] }
 0x1b8   :  { %v2911_v13 = vrot.slane %v1065_v11, %v2905_v54  ;;  %v2913_v60 = vrot.slane %v1065_v11, %v1074_v4  ;;  %v2915_v32 = vrot.slane %v1065_v11, %v1078_v55  ;;  %v2917_v5 = vrot.slane %v1065_v11, %v1082_v7 }
 0x1ba   :  { %v1088_v52 = vmul.f32 %v2911_v13, %v1007_v33  ;;  %v1089_v6 = vmul.f32 %v2913_v60, %v1008_v0  ;;  %v1090_v17 = vmul.f32 %v2915_v32, %v1009_v42  ;;  %v1091_v43 = vmul.f32 %v2917_v5, %v1010_v37 }
 0x1bb   :  { %v1185_v16 = vmul.f32 %v2917_v5, %v2887_v28  ;;  %v1123_v24 = vmul.f32 %v2913_v60, %v2582_v50  ;;  %v1127_v12 = vmul.f32 %v2913_v60, %v2606_v62  ;;  %v1125_v39 = vmul.f32 %v2917_v5, %v2584_v51 }
 0x1bc   :  { %v1096_v10 = vcombine.low %v1088_v52, %v1089_v6  ;;  %v1097_v33 = vcombine.low %v1090_v17, %v1091_v43  ;;  %v1129_v0 = vmul.f32 %v2917_v5, %v2608_v63  ;;  %v1122_v42 = vmul.f32 %v2911_v13, %v2578_v48  ;;  %v3404_v43 = vld [vmem:[#allocation14_spill] sm:$0xff] }
 0x1bd   :  { %v1126_v28 = vmul.f32 %v2911_v13, %v2594_v56  ;;  %v1124_v50 = vmul.f32 %v2915_v32, %v2580_v49  ;;  %v1128_v62 = vmul.f32 %v2915_v32, %v2596_v57  ;;  %v1131_v51 = vmul.f32 %v2913_v60, %v2628_v14 }
 0x1be   :  { %v1104_v37 = vrot.slane %v1096_v10, %v1047_v29  ;;  %v1111_v18 = vrot.slane %v1097_v33, %v1047_v29  ;;  %v1135_v63 = vmul.f32 %v2913_v60, %v2645_v26  ;;  %v1133_v48 = vmul.f32 %v2917_v5, %v2630_v15  ;;  %v3405_v33 = vld [vmem:[#allocation18_spill] sm:$0xff] }
 0x1bf   :  { %v1137_v56 = vmul.f32 %v2917_v5, %v2647_v27  ;;  %v2951_v49 = vmul.f32 %v2911_v13, %v2618_v8  ;;  %v2955_v57 = vmul.f32 %v2911_v13, %v2638_v20  ;;  %v2959_v14 = vmul.f32 %v2915_v32, %v2620_v9  ;;  %v1066_v20 = vld [vmem:[%s3324_s3] sm:$0xf] }
 0x1c0   :  { %v1112_v19 = vcombine.low %v1104_v37, %v1111_v18  ;;  %v2963_v26 = vmul.f32 %v2915_v32, %v2640_v21  ;;  %v2967_v15 = vmul.f32 %v2913_v60, %v2668_v46  ;;  %v2971_v8 = vmul.f32 %v2913_v60, %v2685_v2  ;;  %v3406_v18 = vld [vmem:[#allocation15_spill] sm:$0xff] }
 0x1c1   :  { %v2978_v9 = vmul.f32 %v2917_v5, %v2670_v47  ;;  %v2982_v21 = vmul.f32 %v2917_v5, %v2687_v3  ;;  %v2986_v27 = vmul.f32 %v2911_v13, %v2658_v40  ;;  %v2990_v46 = vmul.f32 %v2911_v13, %v2678_v58 }
 0x1c2   :  { %v1119_v2 = vrot.slane %v1112_v19, %v1047_v29  ;;  %v2994_v23 = vmul.f32 %v2915_v32, %v2660_v41  ;;  %v2998_v47 = vmul.f32 %v2915_v32, %v2680_v59  ;;  %v3002_v3 = vmul.f32 %v2913_v60, %v2708_v30 }
 0x1c3   :  { %v3006_v40 = vmul.f32 %v2913_v60, %v2725_v44  ;;  %v3010_v58 = vmul.f32 %v2917_v5, %v2710_v31  ;;  %v3014_v41 = vmul.f32 %v2917_v5, %v2727_v45  ;;  %v3018_v59 = vmul.f32 %v2911_v13, %v2698_v22 }
 0x1c4   :  { %v1121_v29 = vsub.f32 %v1066_v20, %v1119_v2  ;;  %v3022_v30 = vmul.f32 %v2911_v13, %v2718_v36  ;;  %v3026_v44 = vmul.f32 %v2915_v32, %v3398_v25  ;;  %v3030_v31 = vmul.f32 %v2915_v32, %v3399_v38  ;;  %v3407_v20 = vld [vmem:[#allocation19_spill] sm:$0xff] }
 0x1c5   :  { %v3034_v45 = vmul.f32 %v2913_v60, %v3400_v53  ;;  %v3038_v22 = vmul.f32 %v2913_v60, %v3401_v61  ;;  %v3042_v36 = vmul.f32 %v2917_v5, %v3402_v35  ;;  %v3046_v34 = vmul.f32 %v2917_v5, %v3403_v1 }
 0x1c6   :  { %v3049_v11 = vrot.slane %v1121_v29, %v2905_v54  ;;  %v3051_v52 = vrot.slane %v1121_v29, %v1074_v4  ;;  %v3053_v6 = vrot.slane %v1121_v29, %v1078_v55  ;;  %v3055_v17 = vrot.slane %v1121_v29, %v1082_v7 }
 0x1c7   :  { %v3059_v10 = vmul.f32 %v2911_v13, %v3404_v43  ;;  %v3063_v37 = vmul.f32 %v2911_v13, %v3405_v33  ;;  %v3067_v19 = vmul.f32 %v2915_v32, %v3406_v18  ;;  %v3071_v4 = vmul.f32 %v2915_v32, %v3407_v20 }
 0x1c8   :  { %v3074_v55 = vadd.f32 %v3055_v17, %v1185_v16  ;;  %v1208_v7 = vadd.f32 %v3051_v52, %v1123_v24  ;;  %v1212_v2 = vadd.f32 %v3051_v52, %v1127_v12  ;;  %v1210_v29 = vadd.f32 %v3055_v17, %v1125_v39 }
 0x1c9   :  { %v1214_v25 = vadd.f32 %v3055_v17, %v1129_v0  ;;  %v1207_v38 = vadd.f32 %v3049_v11, %v1122_v42  ;;  %v1211_v53 = vadd.f32 %v3049_v11, %v1126_v28  ;;  %v1209_v61 = vadd.f32 %v3053_v6, %v1124_v50 }
 0x1ca   :  { %3408 = vst [vmem:[#allocation12_spill] sm:$0xff] %v3074_v55  ;;  %v1272_v35 = vmax.f32 %v1208_v7, 0.0  ;;  %v1276_v1 = vmax.f32 %v1212_v2, 0.0  ;;  %v1274_v43 = vmax.f32 %v1210_v29, 0.0  ;;  %v1213_v16 = vadd.f32 %v3053_v6, %v1128_v62 }
 0x1cb   :  { %v1278_v33 = vmax.f32 %v1214_v25, 0.0  ;;  %v1271_v18 = vmax.f32 %v1207_v38, 0.0  ;;  %v1275_v24 = vmax.f32 %v1211_v53, 0.0  ;;  %v1273_v20 = vmax.f32 %v1209_v61, 0.0 }
 0x1cc   :  { %v1336_v12 = vpack.c.bf16 %v1276_v1, %v1272_v35  ;;  %v1277_v54 = vmax.f32 %v1213_v16, 0.0  ;;  %v1216_v39 = vadd.f32 %v3051_v52, %v1131_v51  ;;  %v1220_v0 = vadd.f32 %v3051_v52, %v1135_v63 }
 0x1cd   :  { %v1338_v42 = vpack.c.bf16 %v1278_v33, %v1274_v43  ;;  %v1335_v55 = vpack.c.bf16 %v1275_v24, %v1271_v18  ;;  %v1218_v28 = vadd.f32 %v3055_v17, %v1133_v48  ;;  %v1222_v50 = vadd.f32 %v3055_v17, %v1137_v56 }
 0x1ce   :  { %1655 = vmatprep.mubr.bf16.mxu0 %v1336_v12  ;;  %v1337_v7 = vpack.c.bf16 %v1277_v54, %v1273_v20  ;;  %v1280_v2 = vmax.f32 %v1216_v39, 0.0  ;;  %v1284_v62 = vmax.f32 %v1220_v0, 0.0  ;;  %v1215_v29 = vadd.f32 %v3049_v11, %v2951_v49 }
 0x1cf   :  { %1752 = vmatprep.mubr.bf16.mxu1 %v1338_v42  ;;  %1656 = vmatmul.mubr.bf16.vlgmr.msra.gmra.mrb[32].mxu0 %v1335_v55  ;;  %v1282_v25 = vmax.f32 %v1218_v28, 0.0  ;;  %v1286_v38 = vmax.f32 %v1222_v50, 0.0  ;;  %v1219_v51 = vadd.f32 %v3049_v11, %v2955_v57  ;;  %v1217_v63 = vadd.f32 %v3053_v6, %v2959_v14 }
 0x1d0   :  { %1753 = vmatmul.mubr.bf16.vlgmr.msra.gmra.mrb[32].mxu1 %v1337_v7  ;;  %v1340_v48 = vpack.c.bf16 %v1284_v62, %v1280_v2  ;;  %v1279_v56 = vmax.f32 %v1215_v29, 0.0  ;;  %v1221_v54 = vadd.f32 %v3053_v6, %v2963_v26  ;;  %v1224_v53 = vadd.f32 %v3051_v52, %v2967_v15 }
 0x1d1   :  { %v1342_v49 = vpack.c.bf16 %v1286_v38, %v1282_v25  ;;  %v1283_v61 = vmax.f32 %v1219_v51, 0.0  ;;  %v1281_v55 = vmax.f32 %v1217_v63, 0.0  ;;  %v1228_v35 = vadd.f32 %v3051_v52, %v2971_v8 }
 0x1d2   :  { %1663 = vmatprep.mubr.bf16.mxu0 %v1340_v48  ;;  %v1285_v57 = vmax.f32 %v1221_v54, 0.0  ;;  %v1288_v1 = vmax.f32 %v1224_v53, 0.0  ;;  %v1226_v14 = vadd.f32 %v3055_v17, %v2978_v9  ;;  %v1230_v43 = vadd.f32 %v3055_v17, %v2982_v21 }
 0x1d3   :  { %1760 = vmatprep.mubr.bf16.mxu1 %v1342_v49  ;;  %v1339_v26 = vpack.c.bf16 %v1283_v61, %v1279_v56  ;;  %v1292_v16 = vmax.f32 %v1228_v35, 0.0  ;;  %v1223_v15 = vadd.f32 %v3049_v11, %v2986_v27  ;;  %v1227_v33 = vadd.f32 %v3049_v11, %v2990_v46 }
 0x1d4   :  { %v1341_v18 = vpack.c.bf16 %v1285_v57, %v1281_v55  ;;  %v1290_v8 = vmax.f32 %v1226_v14, 0.0  ;;  %v1294_v24 = vmax.f32 %v1230_v43, 0.0  ;;  %v1225_v20 = vadd.f32 %v3053_v6, %v2994_v23 }
 0x1d5   :  { %v1344_v12 = vpack.c.bf16 %v1292_v16, %v1288_v1  ;;  %v1287_v9 = vmax.f32 %v1223_v15, 0.0  ;;  %v1291_v39 = vmax.f32 %v1227_v33, 0.0  ;;  %v1229_v21 = vadd.f32 %v3053_v6, %v2998_v47  ;;  %v3409_v16 = vld [vmem:[#allocation24_spill] sm:$0xff] }
 0x1d6   :  { %v1346_v0 = vpack.c.bf16 %v1294_v24, %v1290_v8  ;;  %v1289_v42 = vmax.f32 %v1225_v20, 0.0  ;;  %v1232_v27 = vadd.f32 %v3051_v52, %v3002_v3  ;;  %v1236_v46 = vadd.f32 %v3051_v52, %v3006_v40  ;;  %v3410_v15 = vld [vmem:[#allocation28_spill] sm:$0xff]  ;;  %v3411_v8 = vld [vmem:[#allocation25_spill] sm:$0xff] }
 0x1d7   :  { %1664 = vmatmul.mubr.bf16.gmra.mrb[36].mxu0 %v1339_v26  ;;  %v1343_v28 = vpack.c.bf16 %v1291_v39, %v1287_v9  ;;  %v1293_v50 = vmax.f32 %v1229_v21, 0.0  ;;  %v1234_v23 = vadd.f32 %v3055_v17, %v3010_v58  ;;  %v1238_v7 = vadd.f32 %v3055_v17, %v3014_v41  ;;  %v3412_v20 = vld [vmem:[#allocation29_spill] sm:$0xff]  ;;  %v3413_v39 = vld [vmem:[#allocation22_spill] sm:$0xff] }
 0x1d8   :  { %1761 = vmatmul.mubr.bf16.gmra.mrb[36].mxu1 %v1341_v18  ;;  %1671 = vmatprep.mubr.bf16.mxu0 %v1344_v12  ;;  %v1296_v47 = vmax.f32 %v1232_v27, 0.0  ;;  %v1300_v2 = vmax.f32 %v1236_v46, 0.0  ;;  %v1231_v62 = vadd.f32 %v3049_v11, %v3018_v59  ;;  %v1235_v3 = vadd.f32 %v3049_v11, %v3022_v30 }
 0x1d9   :  { %1768 = vmatprep.mubr.bf16.mxu1 %v1346_v0  ;;  %v1345_v40 = vpack.c.bf16 %v1293_v50, %v1289_v42  ;;  %v1298_v29 = vmax.f32 %v1234_v23, 0.0  ;;  %v1302_v25 = vmax.f32 %v1238_v7, 0.0  ;;  %v1233_v58 = vadd.f32 %v3053_v6, %v3026_v44  ;;  %v3414_v0 = vld [vmem:[#allocation26_spill] sm:$0xff]  ;;  %v3415_v50 = vld [vmem:[#allocation23_spill] sm:$0xff] }
 0x1da   :  { %v1348_v38 = vpack.c.bf16 %v1300_v2, %v1296_v47  ;;  %v1295_v51 = vmax.f32 %v1231_v62, 0.0  ;;  %v1299_v41 = vmax.f32 %v1235_v3, 0.0  ;;  %v1237_v63 = vadd.f32 %v3053_v6, %v3030_v31 }
 0x1db   :  { %v1350_v48 = vpack.c.bf16 %v1302_v25, %v1298_v29  ;;  %v1297_v56 = vmax.f32 %v1233_v58, 0.0  ;;  %v1240_v59 = vadd.f32 %v3051_v52, %v3034_v45  ;;  %v1244_v30 = vadd.f32 %v3051_v52, %v3038_v22  ;;  %v3416_v29 = vld [vmem:[#allocation27_spill] sm:$0xff] }
 0x1dc   :  { %v1347_v54 = vpack.c.bf16 %v1299_v41, %v1295_v51  ;;  %v1301_v53 = vmax.f32 %v1237_v63, 0.0  ;;  %v1242_v49 = vadd.f32 %v3055_v17, %v3042_v36  ;;  %v1246_v44 = vadd.f32 %v3055_v17, %v3046_v34  ;;  %v3417_v63 = vld [vmem:[#allocation32_spill] sm:$0xff] }
 0x1dd   :  { %v1304_v61 = vmax.f32 %v1240_v59, 0.0  ;;  %v1308_v55 = vmax.f32 %v1244_v30, 0.0  ;;  %v1239_v31 = vadd.f32 %v3049_v11, %v3059_v10  ;;  %v1243_v35 = vadd.f32 %v3049_v11, %v3063_v37 }
 0x1de   :  { %v1349_v45 = vpack.c.bf16 %v1301_v53, %v1297_v56  ;;  %v1306_v57 = vmax.f32 %v1242_v49, 0.0  ;;  %v1310_v1 = vmax.f32 %v1246_v44, 0.0  ;;  %v1241_v22 = vadd.f32 %v3053_v6, %v3067_v19  ;;  %v3418_v53 = vld [vmem:[#allocation36_spill] sm:$0xff] }
 0x1df   :  { %1672 = vmatmul.mubr.bf16.gmra.mrb[40].mxu0 %v1343_v28  ;;  %v1352_v14 = vpack.c.bf16 %v1308_v55, %v1304_v61  ;;  %v1303_v36 = vmax.f32 %v1239_v31, 0.0  ;;  %v1307_v43 = vmax.f32 %v1243_v35, 0.0  ;;  %v1245_v34 = vadd.f32 %v3053_v6, %v3071_v4  ;;  %v3419_v55 = vld [vmem:[#allocation33_spill] sm:$0xff]  ;;  %v3420_v35 = vld [vmem:[#allocation12_spill] sm:$0xff] }
 0x1e0   :  { %1769 = vmatmul.mubr.bf16.gmra.mrb[40].mxu1 %v1345_v40  ;;  %1679 = vmatprep.mubr.bf16.mxu0 %v1348_v38  ;;  %v1354_v26 = vpack.c.bf16 %v1310_v1, %v1306_v57  ;;  %v1305_v10 = vmax.f32 %v1241_v22, 0.0  ;;  %v1163_v37 = vmul.f32 %v2913_v60, %v3409_v16  ;;  %v1167_v33 = vmul.f32 %v2913_v60, %v3410_v15  ;;  %v3421_v22 = vld [vmem:[#allocation37_spill] sm:$0xff] }
 0x1e1   :  { %1776 = vmatprep.mubr.bf16.mxu1 %v1350_v48  ;;  %v1351_v18 = vpack.c.bf16 %v1307_v43, %v1303_v36  ;;  %v1309_v19 = vmax.f32 %v1245_v34, 0.0  ;;  %v1165_v24 = vmul.f32 %v2917_v5, %v3411_v8  ;;  %v1169_v12 = vmul.f32 %v2917_v5, %v3412_v20  ;;  %v3422_v43 = vld [vmem:[#allocation30_spill] sm:$0xff] }
 0x1e2   :  { %v1248_v4 = vadd.f32 %v3051_v52, %v1163_v37  ;;  %v1252_v9 = vadd.f32 %v3051_v52, %v1167_v33  ;;  %v1162_v21 = vmul.f32 %v2911_v13, %v3413_v39  ;;  %v1166_v42 = vmul.f32 %v2911_v13, %v3414_v0  ;;  %v3424_v37 = vld [vmem:[#allocation31_spill] sm:$0xff] }
 0x1e3   :  { %v1353_v27 = vpack.c.bf16 %v1309_v19, %v1305_v10  ;;  %v1250_v46 = vadd.f32 %v3055_v17, %v1165_v24  ;;  %v1254_v28 = vadd.f32 %v3055_v17, %v1169_v12  ;;  %v1164_v23 = vmul.f32 %v2915_v32, %v3415_v50  ;;  %v3423_v10 = vld [vmem:[#allocation34_spill] sm:$0xff]  ;;  %v3425_v12 = vld [vmem:[#allocation35_spill] sm:$0xff] }
 0x1e4   :  { %v1312_v7 = vmax.f32 %v1248_v4, 0.0  ;;  %v1316_v47 = vmax.f32 %v1252_v9, 0.0  ;;  %v1247_v2 = vadd.f32 %v3049_v11, %v1162_v21  ;;  %v1251_v62 = vadd.f32 %v3049_v11, %v1166_v42  ;;  %v3426_v42 = vld [vmem:[#allocation40_spill] sm:$0xff] }
 0x1e5   :  { %v1314_v3 = vmax.f32 %v1250_v46, 0.0  ;;  %v1318_v40 = vmax.f32 %v1254_v28, 0.0  ;;  %v1168_v25 = vmul.f32 %v2915_v32, %v3416_v29  ;;  %v1249_v58 = vadd.f32 %v3053_v6, %v1164_v23  ;;  %v3429_v29 = vld [vmem:[#allocation38_spill] sm:$0xff] }
 0x1e6   :  { %v1356_v38 = vpack.c.bf16 %v1316_v47, %v1312_v7  ;;  %v1311_v51 = vmax.f32 %v1247_v2, 0.0  ;;  %v1315_v41 = vmax.f32 %v1251_v62, 0.0  ;;  %v1171_v48 = vmul.f32 %v2913_v60, %v3417_v63  ;;  %v3427_v7 = vld [vmem:[#allocation44_spill] sm:$0xff]  ;;  %v3430_v63 = vld [vmem:[#allocation42_spill] sm:$0xff] }
 0x1e7   :  { %1680 = vmatmul.mubr.bf16.gmra.mrb[44].mxu0 %v1347_v54  ;;  %v1358_v56 = vpack.c.bf16 %v1318_v40, %v1314_v3  ;;  %v1253_v59 = vadd.f32 %v3053_v6, %v1168_v25  ;;  %v1313_v30 = vmax.f32 %v1249_v58, 0.0  ;;  %v1175_v49 = vmul.f32 %v2913_v60, %v3418_v53  ;;  %v3428_v3 = vld [vmem:[#allocation41_spill] sm:$0xff] }
 0x1e8   :  { %1777 = vmatmul.mubr.bf16.gmra.mrb[44].mxu1 %v1349_v45  ;;  %1687 = vmatprep.mubr.bf16.mxu0 %v1352_v14  ;;  %v1355_v44 = vpack.c.bf16 %v1315_v41, %v1311_v51  ;;  %v1256_v61 = vadd.f32 %v3051_v52, %v1171_v48  ;;  %v1173_v31 = vmul.f32 %v2917_v5, %v3419_v55  ;;  %v1334_v57 = vmax.f32 %v3420_v35, 0.0 }
 0x1e9   :  { %1784 = vmatprep.mubr.bf16.mxu1 %v1354_v26  ;;  %v1317_v1 = vmax.f32 %v1253_v59, 0.0  ;;  %v1260_v54 = vadd.f32 %v3051_v52, %v1175_v49  ;;  %v1177_v36 = vmul.f32 %v2917_v5, %v3421_v22  ;;  %v1170_v34 = vmul.f32 %v2911_v13, %v3422_v43 }
 0x1ea   :  { %v1320_v45 = vmax.f32 %v1256_v61, 0.0  ;;  %v1258_v14 = vadd.f32 %v3055_v17, %v1173_v31  ;;  %v1174_v16 = vmul.f32 %v2911_v13, %v3423_v10  ;;  %v1172_v15 = vmul.f32 %v2915_v32, %v3424_v37 }
 0x1eb   :  { %v1357_v33 = vpack.c.bf16 %v1317_v1, %v1313_v30  ;;  %v1324_v26 = vmax.f32 %v1260_v54, 0.0  ;;  %v1262_v19 = vadd.f32 %v3055_v17, %v1177_v36  ;;  %v1255_v8 = vadd.f32 %v3049_v11, %v1170_v34  ;;  %v3431_v30 = vld [vmem:[#allocation39_spill] sm:$0xff] }
 0x1ec   :  { %v1322_v24 = vmax.f32 %v1258_v14, 0.0  ;;  %v1259_v20 = vadd.f32 %v3049_v11, %v1174_v16  ;;  %v1176_v4 = vmul.f32 %v2915_v32, %v3425_v12  ;;  %v1257_v9 = vadd.f32 %v3053_v6, %v1172_v15 }
 0x1ed   :  { %v1360_v39 = vpack.c.bf16 %v1324_v26, %v1320_v45  ;;  %v1326_v21 = vmax.f32 %v1262_v19, 0.0  ;;  %v1319_v0 = vmax.f32 %v1255_v8, 0.0  ;;  %v1179_v46 = vmul.f32 %v2913_v60, %v3426_v42 }
 0x1ee   :  { %v1323_v28 = vmax.f32 %v1259_v20, 0.0  ;;  %v1261_v50 = vadd.f32 %v3053_v6, %v1176_v4  ;;  %v1321_v23 = vmax.f32 %v1257_v9, 0.0  ;;  %v1183_v47 = vmul.f32 %v2913_v60, %v3427_v7 }
 0x1ef   :  { %1688 = vmatmul.mubr.bf16.gmra.mrb[48].mxu0 %v1351_v18  ;;  %v1362_v2 = vpack.c.bf16 %v1326_v21, %v1322_v24  ;;  %v1264_v62 = vadd.f32 %v3051_v52, %v1179_v46  ;;  %v1181_v40 = vmul.f32 %v2917_v5, %v3428_v3  ;;  %v1178_v25 = vmul.f32 %v2911_v13, %v3429_v29 }
 0x1f0   :  { %1785 = vmatmul.mubr.bf16.gmra.mrb[48].mxu1 %v1353_v27  ;;  %1695 = vmatprep.mubr.bf16.mxu0 %v1356_v38  ;;  %v1359_v58 = vpack.c.bf16 %v1323_v28, %v1319_v0  ;;  %v1325_v51 = vmax.f32 %v1261_v50, 0.0  ;;  %v1268_v41 = vadd.f32 %v3051_v52, %v1183_v47  ;;  %v1182_v48 = vmul.f32 %v2911_v13, %v3430_v63  ;;  %v3432_v38 = vld [vmem:[#allocation43_spill] sm:$0xff] }
 0x1f1   :  { %1792 = vmatprep.mubr.bf16.mxu1 %v1358_v56  ;;  %v1328_v60 = vmax.f32 %v1264_v62, 0.0  ;;  %v1266_v18 = vadd.f32 %v3055_v17, %v1181_v40  ;;  %v1263_v59 = vadd.f32 %v3049_v11, %v1178_v25  ;;  %v1180_v5 = vmul.f32 %v2915_v32, %v3431_v30 }
 0x1f2   :  { %v1361_v53 = vpack.c.bf16 %v1325_v51, %v1321_v23  ;;  %v1332_v49 = vmax.f32 %v1268_v41, 0.0  ;;  %v1267_v27 = vadd.f32 %v3049_v11, %v1182_v48  ;;  %v1184_v61 = vmul.f32 %v2915_v32, %v3432_v38 }
 0x1f3   :  { %v1330_v52 = vmax.f32 %v1266_v18, 0.0  ;;  %v1327_v55 = vmax.f32 %v1263_v59, 0.0  ;;  %v1265_v13 = vadd.f32 %v3053_v6, %v1180_v5 }
 0x1f4   :  { %v1364_v56 = vpack.c.bf16 %v1332_v49, %v1328_v60  ;;  %v1331_v31 = vmax.f32 %v1267_v27, 0.0  ;;  %v1269_v17 = vadd.f32 %v3053_v6, %v1184_v61 }
 0x1f5   :  { %v1366_v35 = vpack.c.bf16 %v1334_v57, %v1330_v52  ;;  %v1329_v1 = vmax.f32 %v1265_v13, 0.0 }
 0x1f6   :  { %v1363_v54 = vpack.c.bf16 %v1331_v31, %v1327_v55  ;;  %v1333_v22 = vmax.f32 %v1269_v17, 0.0 }
 0x1f7   :  { %1696 = vmatmul.mubr.bf16.gmra.mrb[52].mxu0 %v1355_v44 }
 0x1f8   :  { %1793 = vmatmul.mubr.bf16.gmra.mrb[52].mxu1 %v1357_v33  ;;  %1703 = vmatprep.mubr.bf16.mxu0 %v1360_v39  ;;  %v1365_v36 = vpack.c.bf16 %v1333_v22, %v1329_v1 }
 0x1f9   :  { %1800 = vmatprep.mubr.bf16.mxu1 %v1362_v2 }
 0x1ff   :  { %1704 = vmatmul.mubr.bf16.gmra.mrb[56].mxu0 %v1359_v58 }
 0x200   :  { %1801 = vmatmul.mubr.bf16.gmra.mrb[56].mxu1 %v1361_v53  ;;  %1711 = vmatprep.mubr.bf16.mxu0 %v1364_v56 }
 0x201   :  { %1808 = vmatprep.mubr.bf16.mxu1 %v1366_v35 }
 0x207   :  { %1712 = vmatmul.mubr.bf16.gmra.mrb[60].mxu0 %v1363_v54 }
 0x208   :  { %1809 = vmatmul.mubr.bf16.gmra.mrb[60].mxu1 %v1365_v36 }
 0x2a2   :  { %v2109_v32 = vpop.f32.mrb[32].mxu0 }
 0x2a3   :  { %v2173_v11 = vpop.f32.mrb[32].mxu1  ;;  %v2110_v43 = vpop.f32.mrb[33].mxu0 }
 0x2a4   :  { %v2111_v34 = vadd.f32 %v2110_v43, %v2109_v32  ;;  %v2174_v6 = vpop.f32.mrb[33].mxu1  ;;  %v2112_v57 = vpop.f32.mrb[34].mxu0 }
 0x2a5   :  { %v2175_v45 = vadd.f32 %v2174_v6, %v2173_v11  ;;  %v2176_v14 = vpop.f32.mrb[34].mxu1  ;;  %v2113_v10 = vpop.f32.mrb[35].mxu0 }
 0x2a6   :  { %v2114_v44 = vadd.f32 %v2113_v10, %v2112_v57  ;;  %v2177_v16 = vpop.f32.mrb[35].mxu1 }
 0x2a7   :  { %v3214_v37 = vadd.f32 %v2175_v45, %v2111_v34  ;;  %v2178_v15 = vadd.f32 %v2177_v16, %v2176_v14 }
 0x2a9   :  { %v3216_v33 = vadd.f32 %v2178_v15, %v2114_v44  ;;  %v1838_v7 = vmul.f32 %v3214_v37, %v3214_v37 }
 0x2aa   :  { %v2115_v26 = vpop.f32.mrb[36].mxu0 }
 0x2ab   :  { %v2179_v19 = vpop.f32.mrb[36].mxu1  ;;  %v2116_v8 = vpop.f32.mrb[37].mxu0  ;;  %v1839_v28 = vmul.f32 %v3216_v33, %v3216_v33  ;;  %v1817_v47 = vadd.f32 %v3216_v33, %v3214_v37 }
 0x2ac   :  { %v2117_v24 = vadd.f32 %v2116_v8, %v2115_v26  ;;  %v2180_v20 = vpop.f32.mrb[37].mxu1  ;;  %v2118_v12 = vpop.f32.mrb[38].mxu0 }
 0x2ad   :  { %v2181_v4 = vadd.f32 %v2180_v20, %v2179_v19  ;;  %v2182_v9 = vpop.f32.mrb[38].mxu1  ;;  %v2119_v39 = vpop.f32.mrb[39].mxu0  ;;  %v1854_v58 = vadd.f32 %v1839_v28, %v1838_v7 }
 0x2ae   :  { %v2120_v21 = vadd.f32 %v2119_v39, %v2118_v12  ;;  %v2183_v0 = vpop.f32.mrb[39].mxu1 }
 0x2af   :  { %v3218_v42 = vadd.f32 %v2181_v4, %v2117_v24  ;;  %v2184_v46 = vadd.f32 %v2183_v0, %v2182_v9 }
 0x2b1   :  { %v3222_v50 = vadd.f32 %v2184_v46, %v2120_v21  ;;  %v1840_v2 = vmul.f32 %v3218_v42, %v3218_v42  ;;  %v1818_v51 = vadd.f32 %v1817_v47, %v3218_v42 }
 0x2b2   :  { %v2121_v23 = vpop.f32.mrb[40].mxu0 }
 0x2b3   :  { %v2185_v62 = vpop.f32.mrb[40].mxu1  ;;  %v2122_v3 = vpop.f32.mrb[41].mxu0  ;;  %v1855_v59 = vadd.f32 %v1854_v58, %v1840_v2  ;;  %v1841_v30 = vmul.f32 %v3222_v50, %v3222_v50  ;;  %v1819_v49 = vadd.f32 %v1818_v51, %v3222_v50 }
 0x2b4   :  { %v2123_v40 = vadd.f32 %v2122_v3, %v2121_v23  ;;  %v2186_v29 = vpop.f32.mrb[41].mxu1  ;;  %v2124_v25 = vpop.f32.mrb[42].mxu0 }
 0x2b5   :  { %v2187_v41 = vadd.f32 %v2186_v29, %v2185_v62  ;;  %v2188_v63 = vpop.f32.mrb[42].mxu1  ;;  %v2125_v48 = vpop.f32.mrb[43].mxu0  ;;  %v1856_v52 = vadd.f32 %v1855_v59, %v1841_v30 }
 0x2b6   :  { %v2126_v60 = vadd.f32 %v2125_v48, %v2124_v25  ;;  %v2189_v18 = vpop.f32.mrb[43].mxu1 }
 0x2b7   :  { %v3233_v5 = vadd.f32 %v2187_v41, %v2123_v40  ;;  %v2190_v53 = vadd.f32 %v2189_v18, %v2188_v63 }
 0x2b9   :  { %v1842_v27 = vmul.f32 %v3233_v5, %v3233_v5  ;;  %v3238_v38 = vadd.f32 %v2190_v53, %v2126_v60  ;;  %v1820_v55 = vadd.f32 %v1819_v49, %v3233_v5 }
 0x2ba   :  { %v2127_v61 = vpop.f32.mrb[44].mxu0 }
 0x2bb   :  { %v2191_v13 = vpop.f32.mrb[44].mxu1  ;;  %v2128_v56 = vpop.f32.mrb[45].mxu0  ;;  %v1857_v1 = vadd.f32 %v1856_v52, %v1842_v27  ;;  %v1843_v54 = vmul.f32 %v3238_v38, %v3238_v38  ;;  %v1821_v34 = vadd.f32 %v1820_v55, %v3238_v38 }
 0x2bc   :  { %v2129_v31 = vadd.f32 %v2128_v56, %v2127_v61  ;;  %v2192_v17 = vpop.f32.mrb[45].mxu1  ;;  %v2130_v35 = vpop.f32.mrb[46].mxu0 }
 0x2bd   :  { %v2193_v22 = vadd.f32 %v2192_v17, %v2191_v13  ;;  %v2194_v36 = vpop.f32.mrb[46].mxu1  ;;  %v2131_v32 = vpop.f32.mrb[47].mxu0  ;;  %v1858_v45 = vadd.f32 %v1857_v1, %v1843_v54 }
 0x2be   :  { %v2132_v11 = vadd.f32 %v2131_v32, %v2130_v35  ;;  %v2195_v43 = vpop.f32.mrb[47].mxu1 }
 0x2bf   :  { %v3244_v6 = vadd.f32 %v2193_v22, %v2129_v31  ;;  %v2196_v57 = vadd.f32 %v2195_v43, %v2194_v36 }
 0x2c1   :  { %v1822_v14 = vadd.f32 %v1821_v34, %v3244_v6  ;;  %v1844_v10 = vmul.f32 %v3244_v6, %v3244_v6  ;;  %v3249_v44 = vadd.f32 %v2196_v57, %v2132_v11 }
 0x2c2   :  { %v2133_v16 = vpop.f32.mrb[48].mxu0 }
 0x2c3   :  { %v1859_v15 = vadd.f32 %v1858_v45, %v1844_v10  ;;  %v1823_v26 = vadd.f32 %v1822_v14, %v3249_v44  ;;  %v1845_v19 = vmul.f32 %v3249_v44, %v3249_v44  ;;  %v2197_v8 = vpop.f32.mrb[48].mxu1  ;;  %v2134_v24 = vpop.f32.mrb[49].mxu0 }
 0x2c4   :  { %v2135_v20 = vadd.f32 %v2134_v24, %v2133_v16  ;;  %v2198_v12 = vpop.f32.mrb[49].mxu1  ;;  %v2136_v4 = vpop.f32.mrb[50].mxu0 }
 0x2c5   :  { %v1860_v9 = vadd.f32 %v1859_v15, %v1845_v19  ;;  %v2199_v39 = vadd.f32 %v2198_v12, %v2197_v8  ;;  %v2200_v21 = vpop.f32.mrb[50].mxu1  ;;  %v2137_v0 = vpop.f32.mrb[51].mxu0 }
 0x2c6   :  { %v2138_v46 = vadd.f32 %v2137_v0, %v2136_v4  ;;  %v2201_v28 = vpop.f32.mrb[51].mxu1 }
 0x2c7   :  { %v3254_v23 = vadd.f32 %v2199_v39, %v2135_v20  ;;  %v2202_v7 = vadd.f32 %v2201_v28, %v2200_v21 }
 0x2c9   :  { %v1824_v47 = vadd.f32 %v1823_v26, %v3254_v23  ;;  %v1846_v2 = vmul.f32 %v3254_v23, %v3254_v23  ;;  %v3259_v62 = vadd.f32 %v2202_v7, %v2138_v46 }
 0x2ca   :  { %v2139_v3 = vpop.f32.mrb[52].mxu0 }
 0x2cb   :  { %v1861_v40 = vadd.f32 %v1860_v9, %v1846_v2  ;;  %v1825_v29 = vadd.f32 %v1824_v47, %v3259_v62  ;;  %v1847_v25 = vmul.f32 %v3259_v62, %v3259_v62  ;;  %v2203_v58 = vpop.f32.mrb[52].mxu1  ;;  %v2140_v51 = vpop.f32.mrb[53].mxu0 }
 0x2cc   :  { %v2141_v41 = vadd.f32 %v2140_v51, %v2139_v3  ;;  %v2204_v63 = vpop.f32.mrb[53].mxu1  ;;  %v2142_v48 = vpop.f32.mrb[54].mxu0 }
 0x2cd   :  { %v1862_v60 = vadd.f32 %v1861_v40, %v1847_v25  ;;  %v2205_v18 = vadd.f32 %v2204_v63, %v2203_v58  ;;  %v2206_v59 = vpop.f32.mrb[54].mxu1  ;;  %v2143_v30 = vpop.f32.mrb[55].mxu0 }
 0x2ce   :  { %v2144_v53 = vadd.f32 %v2143_v30, %v2142_v48  ;;  %v2207_v49 = vpop.f32.mrb[55].mxu1 }
 0x2cf   :  { %v3264_v27 = vadd.f32 %v2205_v18, %v2141_v41  ;;  %v2208_v61 = vadd.f32 %v2207_v49, %v2206_v59 }
 0x2d1   :  { %v1826_v52 = vadd.f32 %v1825_v29, %v3264_v27  ;;  %v1848_v55 = vmul.f32 %v3264_v27, %v3264_v27  ;;  %v3269_v13 = vadd.f32 %v2208_v61, %v2144_v53 }
 0x2d2   :  { %v2145_v56 = vpop.f32.mrb[56].mxu0 }
 0x2d3   :  { %v1863_v31 = vadd.f32 %v1862_v60, %v1848_v55  ;;  %v1827_v17 = vadd.f32 %v1826_v52, %v3269_v13  ;;  %v1849_v35 = vmul.f32 %v3269_v13, %v3269_v13  ;;  %v2209_v1 = vpop.f32.mrb[56].mxu1  ;;  %v2146_v54 = vpop.f32.mrb[57].mxu0 }
 0x2d4   :  { %v2147_v22 = vadd.f32 %v2146_v54, %v2145_v56  ;;  %v2210_v36 = vpop.f32.mrb[57].mxu1  ;;  %v2148_v32 = vpop.f32.mrb[58].mxu0 }
 0x2d5   :  { %v1864_v11 = vadd.f32 %v1863_v31, %v1849_v35  ;;  %v2211_v43 = vadd.f32 %v2210_v36, %v2209_v1  ;;  %v2212_v34 = vpop.f32.mrb[58].mxu1  ;;  %v2149_v57 = vpop.f32.mrb[59].mxu0 }
 0x2d6   :  { %v2150_v45 = vadd.f32 %v2149_v57, %v2148_v32  ;;  %v2213_v14 = vpop.f32.mrb[59].mxu1 }
 0x2d7   :  { %v3274_v10 = vadd.f32 %v2211_v43, %v2147_v22  ;;  %v2214_v16 = vadd.f32 %v2213_v14, %v2212_v34  ;;  %v1880_v43 = vld [vmem:[%s3326_s5] sm:$0x1]  ;;  %s2498_s5 = smov [#allocation8]  }
 0x2d9   :  { %v1828_v15 = vadd.f32 %v1827_v17, %v3274_v10  ;;  %v1850_v26 = vmul.f32 %v3274_v10, %v3274_v10  ;;  %v3279_v19 = vadd.f32 %v2214_v16, %v2150_v45  ;;  %v1884_v45 = vld [vmem:[%s3327_s6] sm:$0x1]  ;;  %v3433_v16 = vld [vmem:[#allocation45_spill] sm:$0xff]  ;;  %s1968_s6 = sshll.u32 %s2498_s5, 4  ;;  %s1969_s6 = int_to_ptr.vmem [resolvable:$true] %s1968_s6 }
 0x2da   :  { %v2151_v8 = vpop.f32.mrb[60].mxu0  ;;  %s2460_s23 = scalar_lea.vmem %s1969_s6, 2048  ;;  %p2465_p11 = scmp.lt.s32.totalorder %s1969_s6, %s1969_s6 }
 0x2db   :  { %v1865_v24 = vadd.f32 %v1864_v11, %v1850_v26  ;;  %v1829_v20 = vadd.f32 %v1828_v15, %v3279_v19  ;;  %v1851_v12 = vmul.f32 %v3279_v19, %v3279_v19  ;;  %v2215_v4 = vpop.f32.mrb[60].mxu1  ;;  %v2152_v9 = vpop.f32.mrb[61].mxu0  ;;  %p2461_p10 = scmp.ne.s32.totalorder %s1969_s6, %s2460_s23  ;;  %p2466_p12 = scmp.lt.s32.totalorder %s2460_s23, %s2460_s23 }
 0x2dc   :  { %v2153_v39 = vadd.f32 %v2152_v9, %v2151_v8  ;;  %v2216_v21 = vpop.f32.mrb[61].mxu1  ;;  %v2154_v0 = vpop.f32.mrb[62].mxu0 }
 0x2dd   :  { %v1866_v46 = vadd.f32 %v1865_v24, %v1851_v12  ;;  %v2217_v28 = vadd.f32 %v2216_v21, %v2215_v4  ;;  %v2218_v7 = vpop.f32.mrb[62].mxu1  ;;  %v2155_v47 = vpop.f32.mrb[63].mxu0  ;;  %p2467_p13 = por %p2466_p12, %p2465_p11 }
 0x2de   :  { %v2156_v2 = vadd.f32 %v2155_v47, %v2154_v0  ;;  %v2219_v3 = vpop.f32.mrb[63].mxu1 }
 0x2df   :  { %v1811_v40 = vadd.f32 %v2217_v28, %v2153_v39  ;;  %v2220_v29 = vadd.f32 %v2219_v3, %v2218_v7  ;;  %p2468_p0 = pnand %p2467_p13, %p2461_p10 }
 0x2e1   :  { %v1830_v25 = vadd.f32 %v1829_v20, %v1811_v40  ;;  %v1852_v58 = vmul.f32 %v1811_v40, %v1811_v40  ;;  %v1814_v51 = vadd.f32 %v2220_v29, %v2156_v2 }
 0x2e3   :  { %v1867_v41 = vadd.f32 %v1866_v46, %v1852_v58  ;;  %v1831_v63 = vadd.f32 %v1830_v25, %v1814_v51  ;;  %v1853_v48 = vmul.f32 %v1814_v51, %v1814_v51 }
 0x2e5   :  { %v1832_v60 = vrot.slane %v1831_v63, 4  ;;  %v1868_v18 = vadd.f32 %v1867_v41, %v1853_v48 }
 0x2e7   :  { %v1833_v59 = vadd.f32 %v1832_v60, %v1831_v63  ;;  %v1869_v30 = vrot.slane %v1868_v18, 4 }
 0x2e9   :  { %v1834_v53 = vrot.slane %v1833_v59, 2  ;;  %v1870_v49 = vadd.f32 %v1869_v30, %v1868_v18 }
 0x2eb   :  { %v1835_v61 = vadd.f32 %v1834_v53, %v1833_v59  ;;  %v1871_v52 = vrot.slane %v1870_v49, 2 }
 0x2ed   :  { %v1836_v55 = vrot.slane %v1835_v61, 1  ;;  %v1872_v56 = vadd.f32 %v1871_v52, %v1870_v49 }
 0x2ef   :  { %v1837_v31 = vadd.f32 %v1836_v55, %v1835_v61  ;;  %v1873_v17 = vrot.slane %v1872_v56, 1 }
 0x2f1   :  { %v1874_v35 = vadd.f32 %v1873_v17, %v1872_v56  ;;  %v1875_v1 = vmul.f32 0.0078125, %v1837_v31 }
 0x2f3   :  { %v1876_v54 = vmul.f32 0.0078125, %v1874_v35  ;;  %v1877_v22 = vmul.f32 %v1875_v1, %v1875_v1 }
 0x2f5   :  { %v1878_v36 = vsub.f32 %v1876_v54, %v1877_v22 }
 0x2f7   :  { %v1879_v32 = vmax.f32 %v1878_v36, 0.0 }
 0x2f9   :  { %v1881_v11 = vadd.f32 1e-05, %v1879_v32 }
 0x2fb   :  { %2392 = vrsqrt.f32 %v1881_v11 }
 0x305   :  { %v2393_v34 = vpop.eup %2392 }
 0x306   :  { %v1883_v57 = vmul.f32 %v2393_v34, %v1880_v43 }
 0x308   :  { %v1885_v14 = vmul.f32 %v1883_v57, %v1875_v1  ;;  %v1891_v15 = vrot.slane %v1883_v57, %v3433_v16 }
 0x30a   :  { %v1886_v26 = vsub.f32 %v1884_v45, %v1885_v14  ;;  %v1908_v8 = vmul.f32 %v1891_v15, %v1814_v51  ;;  %v1893_v24 = vmul.f32 %v1891_v15, %v3214_v37  ;;  %v1894_v20 = vmul.f32 %v1891_v15, %v3216_v33 }
 0x30b   :  { %v1895_v12 = vmul.f32 %v1891_v15, %v3218_v42  ;;  %v1896_v4 = vmul.f32 %v1891_v15, %v3222_v50  ;;  %v1897_v9 = vmul.f32 %v1891_v15, %v3233_v5  ;;  %v1898_v39 = vmul.f32 %v1891_v15, %v3238_v38 }
 0x30c   :  { %v1913_v21 = vrot.slane %v1886_v26, %v3433_v16  ;;  %v1899_v0 = vmul.f32 %v1891_v15, %v3244_v6  ;;  %v1900_v46 = vmul.f32 %v1891_v15, %v3249_v44  ;;  %v1901_v28 = vmul.f32 %v1891_v15, %v3254_v23 }
 0x30d   :  { %v1902_v37 = vmul.f32 %v1891_v15, %v3259_v62  ;;  %v1903_v33 = vmul.f32 %v1891_v15, %v3264_v27  ;;  %v1904_v42 = vmul.f32 %v1891_v15, %v3269_v13  ;;  %v1905_v50 = vmul.f32 %v1891_v15, %v3274_v10 }
 0x30e   :  { %v1930_v7 = vadd.f32 %v1913_v21, %v1908_v8  ;;  %v1906_v5 = vmul.f32 %v1891_v15, %v3279_v19  ;;  %v1907_v38 = vmul.f32 %v1891_v15, %v1811_v40  ;;  %v1915_v47 = vadd.f32 %v1913_v21, %v1893_v24 }
 0x30f   :  { %v1916_v2 = vadd.f32 %v1913_v21, %v1894_v20  ;;  %v1917_v3 = vadd.f32 %v1913_v21, %v1895_v12  ;;  %v1918_v6 = vadd.f32 %v1913_v21, %v1896_v4  ;;  %v1919_v29 = vadd.f32 %v1913_v21, %v1897_v9 }
 0x310   :  { %v1946_v44 = vmax.f32 %v1930_v7, 0.0  ;;  %v1920_v25 = vadd.f32 %v1913_v21, %v1898_v39  ;;  %v1921_v23 = vadd.f32 %v1913_v21, %v1899_v0  ;;  %v1922_v58 = vadd.f32 %v1913_v21, %v1900_v46 }
 0x311   :  { %v1923_v62 = vadd.f32 %v1913_v21, %v1901_v28  ;;  %v1924_v51 = vadd.f32 %v1913_v21, %v1902_v37  ;;  %v1925_v27 = vadd.f32 %v1913_v21, %v1903_v33  ;;  %v1926_v41 = vadd.f32 %v1913_v21, %v1904_v42 }
 0x312   :  { %1962 = vst [vmem:[#allocation8 + $0x78] sm:$0xff] %v1946_v44  ;;  %v1927_v13 = vadd.f32 %v1913_v21, %v1905_v50  ;;  %v1928_v10 = vadd.f32 %v1913_v21, %v1906_v5  ;;  %v1929_v63 = vadd.f32 %v1913_v21, %v1907_v38  ;;  %v1931_v48 = vmax.f32 %v1915_v47, 0.0 }
 0x313   :  { %v1932_v19 = vmax.f32 %v1916_v2, 0.0  ;;  %v1933_v40 = vmax.f32 %v1917_v3, 0.0  ;;  %v1934_v60 = vmax.f32 %v1918_v6, 0.0  ;;  %v1935_v18 = vmax.f32 %v1919_v29, 0.0 }
 0x314   :  { %v1936_v59 = vmax.f32 %v1920_v25, 0.0  ;;  %v1937_v30 = vmax.f32 %v1921_v23, 0.0  ;;  %v1938_v53 = vmax.f32 %v1922_v58, 0.0  ;;  %v1939_v49 = vmax.f32 %v1923_v62, 0.0  ;;  %1947 = vst [vmem:[#allocation8] sm:$0xff] %v1931_v48 }
 0x315   :  { %v1940_v61 = vmax.f32 %v1924_v51, 0.0  ;;  %v1941_v52 = vmax.f32 %v1925_v27, 0.0  ;;  %v1942_v55 = vmax.f32 %v1926_v41, 0.0  ;;  %v1943_v56 = vmax.f32 %v1927_v13, 0.0  ;;  %1948 = vst [vmem:[#allocation8 + $0x8] sm:$0xff] %v1932_v19  ;;  %1949 = vst [vmem:[#allocation8 + $0x10] sm:$0xff] %v1933_v40 }
 0x316   :  { %1950 = vst [vmem:[#allocation8 + $0x18] sm:$0xff] %v1934_v60  ;;  %1951 = vst [vmem:[#allocation8 + $0x20] sm:$0xff] %v1935_v18  ;;  %v1944_v31 = vmax.f32 %v1928_v10, 0.0  ;;  %v1945_v17 = vmax.f32 %v1929_v63, 0.0 }
 0x317   :  { %1952 = vst [vmem:[#allocation8 + $0x28] sm:$0xff] %v1936_v59  ;;  %1953 = vst [vmem:[#allocation8 + $0x30] sm:$0xff] %v1937_v30 }
 0x318   :  { %1954 = vst [vmem:[#allocation8 + $0x38] sm:$0xff] %v1938_v53  ;;  %1955 = vst [vmem:[#allocation8 + $0x40] sm:$0xff] %v1939_v49 }
 0x319   :  { %1956 = vst [vmem:[#allocation8 + $0x48] sm:$0xff] %v1940_v61  ;;  %1957 = vst [vmem:[#allocation8 + $0x50] sm:$0xff] %v1941_v52 }
 0x31a   :  { %1958 = vst [vmem:[#allocation8 + $0x58] sm:$0xff] %v1942_v55  ;;  %1959 = vst [vmem:[#allocation8 + $0x60] sm:$0xff] %v1943_v56 }
 0x31b   :  { %1960 = vst [vmem:[#allocation8 + $0x68] sm:$0xff] %v1944_v31  ;;  %1961 = vst [vmem:[#allocation8 + $0x70] sm:$0xff] %v1945_v17 }
 0x31c   :  { %2471 = shalt.err (!%p2468_p0)
}
 0x31d   :  { %s2472_s27 = scalar_lea.hbm %s3328_s7, 2048 }
 0x31e   :  { %p2473_p1 = scmp.ne.s32.totalorder %s3328_s7, %s2472_s27  ;;  %p2476_p2 = scmp.lt.u32.totalorder %s2472_s27, %s3328_s7 }
 0x320   :  { %p2478_p3 = pnand %p2476_p2, %p2473_p1 }
 0x322   :  { %2481 = shalt.err (!%p2478_p3)
}
 0x323   :  { %1974 = dma.vmem_to_hbm [thread:$0]  %s1969_s6, 2048, %s3328_s7, [#allocation4], %s2492_s1, %s2492_s1, %s2493_s25  }
 0x324   :  { %2486 = dma.done.wait [#allocation4], 2048  }
 0x325   :  { %2487 = vsyncadd [#allocation4], 4294965248 }
 0x326   :  { %1978 = vsyncpa [#allocation3], 1 }
 0x327   :  { %1979 = vsyncpa [#allocation6], 1 }
 0x328   :  { %1980 = vsyncpa [#allocation4], 1 }

</bundles_post_ra>
